<compile_context>
chip_gen: v7x
topology: tpu7x:2x2x1
jax: 0.10.0
libtpu: 0.0.40
codegen_flags: <defaults>
</compile_context>

<pallas_src>
from functools import partial

import numpy as np
import jax
import jax.numpy as jnp
from jax import lax
from jax.experimental import pallas as pl
from jax.experimental.pallas import tpu as pltpu


def _round_up(x, m):
    return (x + m - 1) // m * m


def _pad_rows(x, rows):
    pad = rows - x.shape[0]
    if pad == 0:
        return x
    return jnp.pad(x, ((0, pad),) + ((0, 0),) * (x.ndim - 1))


def _temporal_attention_kernel(
        # row-blocked activations
        src_ref, stime_ref, neigh_ref, edge_ref, ntime_ref, mask_ref,
        # param-derived weights (resident, constant index map)
        wqf_ref, wqt_ref, bq_ref,
        wn_ref, we_ref, wt_ref, bkv_ref,
        wow1_ref, bow1_ref, w1s_ref, b1_ref, w2_ref, b2_ref,
        # structural constants (resident)
        g_ref, r_ref, s_ref, a_ref, bc_ref,
        # outputs
        out_ref, attnw_ref,
        *, n_head):
    f32 = jnp.float32
    TB, N = mask_ref.shape
    NDq = g_ref.shape[0]          # N * query_dim
    NH = g_ref.shape[1]           # N * n_head

    def dot(a, b):
        return jnp.dot(a, b, preferred_element_type=f32)

    mask = mask_ref[...].astype(f32)                      # [TB, N]; 1.0 == padded neighbor
    # Rows whose neighborhood is fully padded get neighbor 0 un-masked
    # (matches the in-place fix in the torch forward).
    invalid = jnp.min(mask, axis=1, keepdims=True)        # [TB, 1]; 1.0 iff all padded
    col0 = lax.broadcasted_iota(jnp.int32, (1, N), 1) == 0
    mask_adj = jnp.where((invalid > 0.5) & col0, 0.0, mask)

    # --- Q projection, already tiled over neighbors: q_tiled[:, n*Dq + d] = q[:, d]
    q_tiled = (dot(src_ref[...], wqf_ref[...])
               + dot(stime_ref[...], wqt_ref[...])
               + bq_ref[...])                             # [TB, N*Dq] f32

    # --- fused K|V projection with block-diagonal per-neighbor weights
    kv = (dot(neigh_ref[...], wn_ref[...])
          + dot(edge_ref[...], we_ref[...])
          + dot(ntime_ref[...], wt_ref[...])
          + bkv_ref[...])                                 # [TB, 2*N*Dq] f32
    k_flat = kv[:, :NDq]                                  # col n*Dq + d = k[b, n, d]
    v_flat = kv[:, NDq:]                                  # col n*Dq + d = v[b, n, d]

    # --- per-(neighbor, head) scores, column j = n*H + h (1/sqrt(hd) folded in g)
    scores = dot(q_tiled * k_flat, g_ref[...])            # [TB, N*H]
    mask_rep = dot(mask_adj, r_ref[...])                  # [TB, N*H]
    scores = jnp.where(mask_rep > 0.5, -1e30, scores)

    # --- exact per-head softmax over the neighbor axis (all f32, all 2-D)
    col = lax.broadcasted_iota(jnp.int32, (1, NH), 1)
    m_full = jnp.zeros((TB, NH), f32)
    for h in range(n_head):                               # static, small
        sel = (col % n_head) == h
        m_h = jnp.max(jnp.where(sel, scores, -1e30), axis=1, keepdims=True)
        m_full = m_full + jnp.where(sel, m_h, 0.0)
    p = jnp.exp(scores - m_full)                          # [TB, N*H]
    denom = dot(p, s_ref[...])                            # per-head sum, broadcast back
    w = p / denom                                         # exact divide (weights are an output)

    attnw = dot(w, a_ref[...])                            # head-averaged weights [TB, N]
    attnw = jnp.where(invalid > 0.5, 0.0, attnw)

    # --- value reduction + out_proj fused into MergeLayer fc1 (attn part)
    w_bcast = dot(w, bc_ref[...])                         # [TB, N*Dq]
    attn_fc1 = dot(w_bcast * v_flat, wow1_ref[...]) + bow1_ref[...]   # [TB, F]
    attn_fc1 = jnp.where(invalid > 0.5, 0.0, attn_fc1)    # masked_fill(invalid, 0) before merger

    h1 = jnp.maximum(attn_fc1 + dot(src_ref[...], w1s_ref[...]) + b1_ref[...], 0.0)
    y = dot(h1, w2_ref[...]) + b2_ref[...]

    out_ref[...] = y.astype(out_ref.dtype)
    attnw_ref[...] = attnw.astype(attnw_ref.dtype)


def temporal_attention_forward(params, src_node, src_time, neigh, neigh_time,
                               edge, padding_mask, *, n_head=2, tile_b=None,
                               compute_dtype=jnp.bfloat16):
    """Forward pass.  compute_dtype=bfloat16 (default) halves HBM read traffic of
    the activation inputs; accumulation and softmax stay f32."""
    f32 = jnp.float32
    B, F = src_node.shape
    N, Fn = neigh.shape[1], neigh.shape[2]
    T = src_time.shape[-1]
    E = edge.shape[2]
    Dq = F + T
    hd = Dq // n_head
    NH = N * n_head
    NDq = N * Dq
    out_dim = params["w2"].shape[0]
    cd = compute_dtype

    if tile_b is None:
        # >=2 row tiles for large batches (dual-TC sharding on v7x), capped so the
        # double-buffered blocks + f32 intermediates stay well inside VMEM.
        tile_b = _round_up(max(16, min(2048, -(-B // 2))), 16) if B > 512 else _round_up(B, 16)
    tile_b = _round_up(tile_b, 16)
    Bp = _round_up(B, tile_b)
    nb = Bp // tile_b

    # ---- activations: pure reshapes to lane-dense 2-D slabs (no concats) ----
    data = (
        _pad_rows(src_node, Bp).astype(cd),                       # [Bp, F]
        _pad_rows(src_time.reshape(B, T), Bp).astype(cd),         # [Bp, T]
        _pad_rows(neigh.reshape(B, N * Fn), Bp).astype(cd),       # [Bp, N*Fn]
        _pad_rows(edge.reshape(B, N * E), Bp).astype(cd),         # [Bp, N*E]
        _pad_rows(neigh_time.reshape(B, N * T), Bp).astype(cd),   # [Bp, N*T]
        _pad_rows(padding_mask.astype(f32), Bp),                  # [Bp, N]
    )

    # ---- param-derived weights (small; built once per traced call) ----
    wq, wk, wv = params["wq"], params["wk"], params["wv"]
    w1 = params["w1"]
    eyeN = jnp.eye(N, dtype=f32)

    def kv_blockdiag(lo, hi):
        # [N*width, 2*N*Dq]: block (n, n) applies Wk^T | Wv^T of the feature slice.
        return jnp.concatenate(
            [jnp.kron(eyeN, wk[:, lo:hi].T), jnp.kron(eyeN, wv[:, lo:hi].T)], axis=1)

    wo_big = jnp.tile(params["wo"].T, (N, 1))                     # [N*Dq, Dq]
    weights = (
        jnp.tile(wq[:, :F].T, (1, N)).astype(cd),                 # wqf  [F, N*Dq]
        jnp.tile(wq[:, F:].T, (1, N)).astype(cd),                 # wqt  [T, N*Dq]
        jnp.tile(params["bq"], N).reshape(1, -1).astype(f32),     # bq   [1, N*Dq]
        kv_blockdiag(0, Fn).astype(cd),                           # wn   [N*Fn, 2*N*Dq]
        kv_blockdiag(Fn, Fn + E).astype(cd),                      # we   [N*E,  2*N*Dq]
        kv_blockdiag(Fn + E, Fn + E + T).astype(cd),              # wt   [N*T,  2*N*Dq]
        jnp.concatenate([jnp.tile(params["bk"], N),
                         jnp.tile(params["bv"], N)]).reshape(1, -1).astype(f32),
        (wo_big @ w1[:, :Dq].T).astype(f32),                      # wow1 [N*Dq, F]
        (params["bo"].reshape(1, -1) @ w1[:, :Dq].T).astype(f32), # bow1 [1, F]
        w1[:, Dq:].T.astype(f32),                                 # w1s  [F, F]
        params["b1"].reshape(1, -1).astype(f32),                  # [1, F]
        params["w2"].T.astype(f32),                               # [F, out_dim]
        params["b2"].reshape(1, -1).astype(f32),                  # [1, out_dim]
    )

    # ---- structural constants (trace-time numpy, passed once) ----
    i_ndq = np.arange(NDq)
    j_nh = np.arange(NH)
    g = ((i_ndq[:, None] // hd) == j_nh[None, :]).astype(np.float32) / np.sqrt(hd)
    r = ((j_nh[None, :] // n_head) == np.arange(N)[:, None]).astype(np.float32)     # [N, NH]
    s = ((j_nh[:, None] % n_head) == (j_nh[None, :] % n_head)).astype(np.float32)   # [NH, NH]
    a = ((j_nh[:, None] // n_head) == np.arange(N)[None, :]).astype(np.float32) / n_head
    bc = (j_nh[:, None] ==
          ((i_ndq // Dq) * n_head + (i_ndq % Dq) // hd)[None, :]).astype(np.float32)  # [NH, NDq]
    consts = tuple(jnp.asarray(c) for c in (g, r, s, a, bc))

    def row_spec(x):
        return pl.BlockSpec((tile_b, x.shape[1]), lambda b: (b, 0))

    def full_spec(x):
        return pl.BlockSpec(x.shape, lambda b: (0, 0))

    in_specs = ([row_spec(x) for x in data]
                + [full_spec(x) for x in weights]
                + [full_spec(x) for x in consts])
    out_specs = [pl.BlockSpec((tile_b, out_dim), lambda b: (b, 0)),
                 pl.BlockSpec((tile_b, N), lambda b: (b, 0))]
    out_shape = [jax.ShapeDtypeStruct((Bp, out_dim), f32),
                 jax.ShapeDtypeStruct((Bp, N), f32)]

    # VMEM budget: double-buffered row blocks + resident weights + f32 intermediates.
    cd_bytes = jnp.dtype(cd).itemsize
    block_bytes = tile_b * ((F + T + N * (Fn + E + T)) * cd_bytes
                            + N * 4 + (out_dim + N) * 4)
    resident = sum(int(np.prod(x.shape)) * jnp.dtype(x.dtype).itemsize
                   for x in weights + consts)
    interm = tile_b * (6 * NDq + 2 * NH + 64) * 4
    vmem_limit = int(max(32 << 20,
                         min(60 << 20, 2 * block_bytes + resident + interm + (4 << 20))))

    # NOTE: if the trace shows exposed DMA on the neighbor slabs, add
    # pipeline_mode=pl.Buffered(3) to their row_spec (budget-check on v7x first).
    y, w = pl.pallas_call(
        partial(_temporal_attention_kernel, n_head=n_head),
        grid=(nb,),
        in_specs=in_specs,
        out_specs=out_specs,
        out_shape=out_shape,
        compiler_params=pltpu.CompilerParams(
            dimension_semantics=("parallel",),
            vmem_limit_bytes=vmem_limit),
    )(*data, *weights, *consts)

    return y[:B], w[:B]            # [B, out_dim], [B, N]


def reference(params, src_node, src_time, neigh, neigh_time, edge, mask, *, n_head=2):
    """Pure-JAX mirror of the torch forward (eval mode), for verification."""
    query_in = jnp.concatenate([src_node, src_time[:, 0, :]], axis=1)
    key_in = jnp.concatenate([neigh, edge, neigh_time], axis=2)

    invalid = jnp.all(mask > 0.5, axis=1, keepdims=True)               # [B,1] bool
    mask_adj = mask.at[:, 0].set(jnp.where(invalid[:, 0], 0.0, mask[:, 0]))

    q = query_in @ params["wq"].T + params["bq"]
    k = jnp.einsum("bnk,qk->bnq", key_in, params["wk"]) + params["bk"]
    v = jnp.einsum("bnk,qk->bnq", key_in, params["wv"]) + params["bv"]

    B, N, Dq = k.shape
    hd = Dq // n_head
    qh = q.reshape(B, n_head, hd)
    kh = k.reshape(B, N, n_head, hd)
    vh = v.reshape(B, N, n_head, hd)

    scores = jnp.einsum("bhd,bnhd->bhn", qh, kh) / jnp.sqrt(jnp.float32(hd))
    scores = jnp.where(mask_adj[:, None, :] > 0.5, -1e30, scores)
    w = jax.nn.softmax(scores, axis=-1)
    attn = jnp.einsum("bhn,bnhd->bhd", w, vh).reshape(B, Dq)
    attn = attn @ params["wo"].T + params["bo"]
    avg_w = w.mean(axis=1)

    attn = jnp.where(invalid, 0.0, attn)
    avg_w = jnp.where(invalid, 0.0, avg_w)

    x = jnp.concatenate([attn, src_node], axis=1)
    h1 = jax.nn.relu(x @ params["w1"].T + params["b1"])
    y = h1 @ params["w2"].T + params["b2"]
    return y, avg_w


if __name__ == "__main__":
    # small shapes consistent with the module
    B, N = 20, 8         # batch, n_neighbors
    F = 8                # n_node_features == n_neighbors_features
    T = 8                # time_dim
    E = 8                # n_edge_features
    H = 2                # n_head
    OUT = 8              # output_dimension
    Dq, Dk = F + T, F + E + T

    root = jax.random.PRNGKey(0)
    ks = jax.random.split(root, 20)
    nrm = lambda k, s: 0.1 * jax.random.normal(k, s, jnp.float32)
    params = dict(
        wq=nrm(ks[0], (Dq, Dq)), wk=nrm(ks[1], (Dq, Dk)), wv=nrm(ks[2], (Dq, Dk)),
        bq=nrm(ks[3], (Dq,)), bk=nrm(ks[4], (Dq,)), bv=nrm(ks[5], (Dq,)),
        wo=nrm(ks[6], (Dq, Dq)), bo=nrm(ks[7], (Dq,)),
        w1=nrm(ks[8], (F, Dq + F)), b1=nrm(ks[9], (F,)),
        w2=nrm(ks[10], (OUT, F)), b2=nrm(ks[11], (OUT,)),
    )

    src_node = jax.random.normal(ks[12], (B, F), jnp.float32)
    src_time = jax.random.normal(ks[13], (B, 1, T), jnp.float32)
    neigh = jax.random.normal(ks[14], (B, N, F), jnp.float32)
    neigh_time = jax.random.normal(ks[15], (B, N, T), jnp.float32)
    edge = jax.random.normal(ks[16], (B, N, E), jnp.float32)

    mask_bool = jax.random.bernoulli(ks[17], 0.3, (B, N))
    mask_bool = mask_bool.at[1, :].set(True)     # one fully-padded neighborhood
    mask = mask_bool.astype(jnp.float32)         # 1.0 == padded (torch bool True)

    y_ref, w_ref = reference(params, src_node, src_time, neigh, neigh_time,
                             edge, mask, n_head=H)

    # f32 path (tile_b=16 forces multiple grid steps + batch padding) -- strict check
    y, w = temporal_attention_forward(params, src_node, src_time, neigh, neigh_time,
                                      edge, mask, n_head=H, tile_b=16,
                                      compute_dtype=jnp.float32)
    y, w = jax.block_until_ready((y, w))
    np.testing.assert_allclose(np.asarray(y), np.asarray(y_ref), rtol=2e-3, atol=2e-3)
    np.testing.assert_allclose(np.asarray(w), np.asarray(w_ref), rtol=2e-3, atol=2e-3)

    # default bf16 activation path -- sanity check with loose tolerance
    y16, w16 = temporal_attention_forward(params, src_node, src_time, neigh,
                                          neigh_time, edge, mask, n_head=H, tile_b=16)
    y16, w16 = jax.block_until_ready((y16, w16))
    np.testing.assert_allclose(np.asarray(y16), np.asarray(y_ref), rtol=5e-2, atol=5e-2)
    np.testing.assert_allclose(np.asarray(w16), np.asarray(w_ref), rtol=5e-2, atol=5e-2)

    print("KERNEL_OK")
</pallas_src>

<mosaic_0001>
module attributes {stable_mosaic.version = 11 : i64} {
  func.func @_temporal_attention_kernel(%arg0: i32, %arg1: memref<16x8xf32, #tpu.memory_space<vmem>>, %arg2: memref<16x8xf32, #tpu.memory_space<vmem>>, %arg3: memref<16x64xf32, #tpu.memory_space<vmem>>, %arg4: memref<16x64xf32, #tpu.memory_space<vmem>>, %arg5: memref<16x64xf32, #tpu.memory_space<vmem>>, %arg6: memref<16x8xf32, #tpu.memory_space<vmem>>, %arg7: memref<8x128xf32, #tpu.memory_space<vmem>>, %arg8: memref<8x128xf32, #tpu.memory_space<vmem>>, %arg9: memref<1x128xf32, #tpu.memory_space<vmem>>, %arg10: memref<64x256xf32, #tpu.memory_space<vmem>>, %arg11: memref<64x256xf32, #tpu.memory_space<vmem>>, %arg12: memref<64x256xf32, #tpu.memory_space<vmem>>, %arg13: memref<1x256xf32, #tpu.memory_space<vmem>>, %arg14: memref<128x8xf32, #tpu.memory_space<vmem>>, %arg15: memref<1x8xf32, #tpu.memory_space<vmem>>, %arg16: memref<8x8xf32, #tpu.memory_space<vmem>>, %arg17: memref<1x8xf32, #tpu.memory_space<vmem>>, %arg18: memref<8x8xf32, #tpu.memory_space<vmem>>, %arg19: memref<1x8xf32, #tpu.memory_space<vmem>>, %arg20: memref<128x16xf32, #tpu.memory_space<vmem>>, %arg21: memref<8x16xf32, #tpu.memory_space<vmem>>, %arg22: memref<16x16xf32, #tpu.memory_space<vmem>>, %arg23: memref<16x8xf32, #tpu.memory_space<vmem>>, %arg24: memref<16x128xf32, #tpu.memory_space<vmem>>, %arg25: memref<16x8xf32, #tpu.memory_space<vmem>>, %arg26: memref<16x8xf32, #tpu.memory_space<vmem>>) attributes {dimension_semantics = [#tpu.dimension_semantics<parallel>], iteration_bounds = array<i64: 2>, scalar_prefetch = 0 : i64, scratch_operands = 0 : i64, tpu.core_type = #tpu.core_type<tc>, window_params = [{transform_indices = @transform_0, window_bounds = array<i64: 16, 8>}, {transform_indices = @transform_1, window_bounds = array<i64: 16, 8>}, {transform_indices = @transform_2, window_bounds = array<i64: 16, 64>}, {transform_indices = @transform_3, window_bounds = array<i64: 16, 64>}, {transform_indices = @transform_4, window_bounds = array<i64: 16, 64>}, {transform_indices = @transform_5, window_bounds = array<i64: 16, 8>}, {pipeline_mode = #tpu.pipeline_mode<synchronous>, transform_indices = @transform_6, window_bounds = array<i64: 8, 128>}, {pipeline_mode = #tpu.pipeline_mode<synchronous>, transform_indices = @transform_7, window_bounds = array<i64: 8, 128>}, {pipeline_mode = #tpu.pipeline_mode<synchronous>, transform_indices = @transform_8, window_bounds = array<i64: 1, 128>}, {pipeline_mode = #tpu.pipeline_mode<synchronous>, transform_indices = @transform_9, window_bounds = array<i64: 64, 256>}, {pipeline_mode = #tpu.pipeline_mode<synchronous>, transform_indices = @transform_10, window_bounds = array<i64: 64, 256>}, {pipeline_mode = #tpu.pipeline_mode<synchronous>, transform_indices = @transform_11, window_bounds = array<i64: 64, 256>}, {pipeline_mode = #tpu.pipeline_mode<synchronous>, transform_indices = @transform_12, window_bounds = array<i64: 1, 256>}, {pipeline_mode = #tpu.pipeline_mode<synchronous>, transform_indices = @transform_13, window_bounds = array<i64: 128, 8>}, {pipeline_mode = #tpu.pipeline_mode<synchronous>, transform_indices = @transform_14, window_bounds = array<i64: 1, 8>}, {pipeline_mode = #tpu.pipeline_mode<synchronous>, transform_indices = @transform_15, window_bounds = array<i64: 8, 8>}, {pipeline_mode = #tpu.pipeline_mode<synchronous>, transform_indices = @transform_16, window_bounds = array<i64: 1, 8>}, {pipeline_mode = #tpu.pipeline_mode<synchronous>, transform_indices = @transform_17, window_bounds = array<i64: 8, 8>}, {pipeline_mode = #tpu.pipeline_mode<synchronous>, transform_indices = @transform_18, window_bounds = array<i64: 1, 8>}, {pipeline_mode = #tpu.pipeline_mode<synchronous>, transform_indices = @transform_19, window_bounds = array<i64: 128, 16>}, {pipeline_mode = #tpu.pipeline_mode<synchronous>, transform_indices = @transform_20, window_bounds = array<i64: 8, 16>}, {pipeline_mode = #tpu.pipeline_mode<synchronous>, transform_indices = @transform_21, window_bounds = array<i64: 16, 16>}, {pipeline_mode = #tpu.pipeline_mode<synchronous>, transform_indices = @transform_22, window_bounds = array<i64: 16, 8>}, {pipeline_mode = #tpu.pipeline_mode<synchronous>, transform_indices = @transform_23, window_bounds = array<i64: 16, 128>}, {transform_indices = @transform_24, window_bounds = array<i64: 16, 8>}, {transform_indices = @transform_25, window_bounds = array<i64: 16, 8>}]} {
    %c0 = arith.constant 0 : index
    %c0_0 = arith.constant 0 : index
    %0 = vector.load %arg6[%c0, %c0_0] : memref<16x8xf32, #tpu.memory_space<vmem>>, vector<16x8xf32>
    %cst = arith.constant dense<0x7F800000> : vector<16xf32>
    %1 = vector.multi_reduction <minimumf>, %0, %cst [1] : vector<16x8xf32> to vector<16xf32>
    %2 = vector.shape_cast %1 : vector<16xf32> to vector<16x1xf32>
    %3 = tpu.iota {dimensions = array<i32: 1>} : vector<1x8xi32>
    %c0_i32 = arith.constant 0 : i32
    %4 = vector.broadcast %c0_i32 : i32 to vector<1x8xi32>
    %5 = arith.cmpi eq, %3, %4 : vector<1x8xi32>
    %cst_1 = arith.constant 5.000000e-01 : f32
    %6 = vector.broadcast %cst_1 : f32 to vector<16x1xf32>
    %7 = arith.cmpf ogt, %2, %6 : vector<16x1xf32>
    %8 = vector.broadcast %7 : vector<16x1xi1> to vector<16x8xi1>
    %9 = vector.broadcast %5 : vector<1x8xi1> to vector<16x8xi1>
    %10 = arith.andi %8, %9 : vector<16x8xi1>
    %cst_2 = arith.constant 0.000000e+00 : f32
    %11 = vector.broadcast %cst_2 : f32 to vector<16x8xf32>
    %12 = arith.select %10, %11, %0 : vector<16x8xi1>, vector<16x8xf32>
    %c0_3 = arith.constant 0 : index
    %c0_4 = arith.constant 0 : index
    %13 = vector.load %arg1[%c0_3, %c0_4] : memref<16x8xf32, #tpu.memory_space<vmem>>, vector<16x8xf32>
    %c0_5 = arith.constant 0 : index
    %c0_6 = arith.constant 0 : index
    %14 = vector.load %arg7[%c0_5, %c0_6] : memref<8x128xf32, #tpu.memory_space<vmem>>, vector<8x128xf32>
    %cst_7 = arith.constant dense<0.000000e+00> : vector<16x128xf32>
    %15 = tpu.matmul %13, %14, %cst_7 {dimension_numbers = #tpu.dot_dimension_numbers<[1], [0], [0], [1], [0, 0, 1, 1], [], []>} : vector<16x8xf32>, vector<8x128xf32>, vector<16x128xf32> -> vector<16x128xf32>
    %c0_8 = arith.constant 0 : index
    %c0_9 = arith.constant 0 : index
    %16 = vector.load %arg2[%c0_8, %c0_9] : memref<16x8xf32, #tpu.memory_space<vmem>>, vector<16x8xf32>
    %c0_10 = arith.constant 0 : index
    %c0_11 = arith.constant 0 : index
    %17 = vector.load %arg8[%c0_10, %c0_11] : memref<8x128xf32, #tpu.memory_space<vmem>>, vector<8x128xf32>
    %cst_12 = arith.constant dense<0.000000e+00> : vector<16x128xf32>
    %18 = tpu.matmul %16, %17, %cst_12 {dimension_numbers = #tpu.dot_dimension_numbers<[1], [0], [0], [1], [0, 0, 1, 1], [], []>} : vector<16x8xf32>, vector<8x128xf32>, vector<16x128xf32> -> vector<16x128xf32>
    %19 = arith.addf %15, %18 : vector<16x128xf32>
    %c0_13 = arith.constant 0 : index
    %c0_14 = arith.constant 0 : index
    %20 = vector.load %arg9[%c0_13, %c0_14] : memref<1x128xf32, #tpu.memory_space<vmem>>, vector<1x128xf32>
    %21 = vector.broadcast %20 : vector<1x128xf32> to vector<16x128xf32>
    %22 = arith.addf %19, %21 : vector<16x128xf32>
    %c0_15 = arith.constant 0 : index
    %c0_16 = arith.constant 0 : index
    %23 = vector.load %arg3[%c0_15, %c0_16] : memref<16x64xf32, #tpu.memory_space<vmem>>, vector<16x64xf32>
    %c0_17 = arith.constant 0 : index
    %c0_18 = arith.constant 0 : index
    %24 = vector.load %arg10[%c0_17, %c0_18] : memref<64x256xf32, #tpu.memory_space<vmem>>, vector<64x256xf32>
    %cst_19 = arith.constant dense<0.000000e+00> : vector<16x256xf32>
    %25 = tpu.matmul %23, %24, %cst_19 {dimension_numbers = #tpu.dot_dimension_numbers<[1], [0], [0], [1], [0, 0, 1, 1], [], []>} : vector<16x64xf32>, vector<64x256xf32>, vector<16x256xf32> -> vector<16x256xf32>
    %c0_20 = arith.constant 0 : index
    %c0_21 = arith.constant 0 : index
    %26 = vector.load %arg4[%c0_20, %c0_21] : memref<16x64xf32, #tpu.memory_space<vmem>>, vector<16x64xf32>
    %c0_22 = arith.constant 0 : index
    %c0_23 = arith.constant 0 : index
    %27 = vector.load %arg11[%c0_22, %c0_23] : memref<64x256xf32, #tpu.memory_space<vmem>>, vector<64x256xf32>
    %cst_24 = arith.constant dense<0.000000e+00> : vector<16x256xf32>
    %28 = tpu.matmul %26, %27, %cst_24 {dimension_numbers = #tpu.dot_dimension_numbers<[1], [0], [0], [1], [0, 0, 1, 1], [], []>} : vector<16x64xf32>, vector<64x256xf32>, vector<16x256xf32> -> vector<16x256xf32>
    %29 = arith.addf %25, %28 : vector<16x256xf32>
    %c0_25 = arith.constant 0 : index
    %c0_26 = arith.constant 0 : index
    %30 = vector.load %arg5[%c0_25, %c0_26] : memref<16x64xf32, #tpu.memory_space<vmem>>, vector<16x64xf32>
    %c0_27 = arith.constant 0 : index
    %c0_28 = arith.constant 0 : index
    %31 = vector.load %arg12[%c0_27, %c0_28] : memref<64x256xf32, #tpu.memory_space<vmem>>, vector<64x256xf32>
    %cst_29 = arith.constant dense<0.000000e+00> : vector<16x256xf32>
    %32 = tpu.matmul %30, %31, %cst_29 {dimension_numbers = #tpu.dot_dimension_numbers<[1], [0], [0], [1], [0, 0, 1, 1], [], []>} : vector<16x64xf32>, vector<64x256xf32>, vector<16x256xf32> -> vector<16x256xf32>
    %33 = arith.addf %29, %32 : vector<16x256xf32>
    %c0_30 = arith.constant 0 : index
    %c0_31 = arith.constant 0 : index
    %34 = vector.load %arg13[%c0_30, %c0_31] : memref<1x256xf32, #tpu.memory_space<vmem>>, vector<1x256xf32>
    %35 = vector.broadcast %34 : vector<1x256xf32> to vector<16x256xf32>
    %36 = arith.addf %33, %35 : vector<16x256xf32>
    %37 = vector.extract_strided_slice %36 {offsets = [0, 0], sizes = [16, 128], strides = [1, 1]} : vector<16x256xf32> to vector<16x128xf32>
    %38 = vector.extract_strided_slice %36 {offsets = [0, 128], sizes = [16, 128], strides = [1, 1]} : vector<16x256xf32> to vector<16x128xf32>
    %39 = arith.mulf %22, %37 : vector<16x128xf32>
    %c0_32 = arith.constant 0 : index
    %c0_33 = arith.constant 0 : index
    %40 = vector.load %arg20[%c0_32, %c0_33] : memref<128x16xf32, #tpu.memory_space<vmem>>, vector<128x16xf32>
    %cst_34 = arith.constant dense<0.000000e+00> : vector<16x16xf32>
    %41 = tpu.matmul %39, %40, %cst_34 {dimension_numbers = #tpu.dot_dimension_numbers<[1], [0], [0], [1], [0, 0, 1, 1], [], []>} : vector<16x128xf32>, vector<128x16xf32>, vector<16x16xf32> -> vector<16x16xf32>
    %c0_35 = arith.constant 0 : index
    %c0_36 = arith.constant 0 : index
    %42 = vector.load %arg21[%c0_35, %c0_36] : memref<8x16xf32, #tpu.memory_space<vmem>>, vector<8x16xf32>
    %cst_37 = arith.constant dense<0.000000e+00> : vector<16x16xf32>
    %43 = tpu.matmul %12, %42, %cst_37 {dimension_numbers = #tpu.dot_dimension_numbers<[1], [0], [0], [1], [0, 0, 1, 1], [], []>} : vector<16x8xf32>, vector<8x16xf32>, vector<16x16xf32> -> vector<16x16xf32>
    %cst_38 = arith.constant 5.000000e-01 : f32
    %44 = vector.broadcast %cst_38 : f32 to vector<16x16xf32>
    %45 = arith.cmpf ogt, %43, %44 : vector<16x16xf32>
    %cst_39 = arith.constant -1.000000e+30 : f32
    %46 = vector.broadcast %cst_39 : f32 to vector<16x16xf32>
    %47 = arith.select %45, %46, %41 : vector<16x16xi1>, vector<16x16xf32>
    %48 = tpu.iota {dimensions = array<i32: 1>} : vector<1x16xi32>
    %cst_40 = arith.constant 0.000000e+00 : f32
    %49 = vector.broadcast %cst_40 : f32 to vector<16x16xf32>
    %c2_i32 = arith.constant 2 : i32
    %c0_i32_41 = arith.constant 0 : i32
    %50 = arith.cmpi eq, %c2_i32, %c0_i32_41 : i32
    %c1_i32 = arith.constant 1 : i32
    %51 = arith.select %50, %c1_i32, %c2_i32 : i32
    %52 = vector.broadcast %51 : i32 to vector<1x16xi32>
    %53 = arith.remsi %48, %52 : vector<1x16xi32>
    %c0_i32_42 = arith.constant 0 : i32
    %54 = vector.broadcast %c0_i32_42 : i32 to vector<1x16xi32>
    %55 = arith.cmpi ne, %53, %54 : vector<1x16xi32>
    %c0_i32_43 = arith.constant 0 : i32
    %56 = vector.broadcast %c0_i32_43 : i32 to vector<1x16xi32>
    %57 = arith.cmpi slt, %53, %56 : vector<1x16xi32>
    %c0_i32_44 = arith.constant 0 : i32
    %58 = arith.cmpi slt, %51, %c0_i32_44 : i32
    %59 = vector.broadcast %58 : i1 to vector<1x16xi1>
    %60 = vector.broadcast %59 : vector<1x16xi1> to vector<1x16xi1>
    %61 = arith.xori %57, %60 : vector<1x16xi1>
    %62 = arith.andi %61, %55 : vector<1x16xi1>
    %63 = vector.broadcast %51 : i32 to vector<1x16xi32>
    %64 = arith.addi %53, %63 : vector<1x16xi32>
    %65 = arith.select %62, %64, %53 : vector<1x16xi1>, vector<1x16xi32>
    %c0_i32_45 = arith.constant 0 : i32
    %66 = vector.broadcast %c0_i32_45 : i32 to vector<1x16xi32>
    %67 = arith.cmpi eq, %65, %66 : vector<1x16xi32>
    %cst_46 = arith.constant -1.000000e+30 : f32
    %68 = vector.shape_cast %67 : vector<1x16xi1> to vector<1x16xi1>
    %69 = vector.broadcast %68 : vector<1x16xi1> to vector<16x16xi1>
    %70 = vector.broadcast %cst_46 : f32 to vector<16x16xf32>
    %71 = arith.select %69, %47, %70 : vector<16x16xi1>, vector<16x16xf32>
    %cst_47 = arith.constant dense<0xFF800000> : vector<16xf32>
    %72 = vector.multi_reduction <maximumf>, %71, %cst_47 [1] : vector<16x16xf32> to vector<16xf32>
    %73 = vector.shape_cast %72 : vector<16xf32> to vector<16x1xf32>
    %cst_48 = arith.constant 0.000000e+00 : f32
    %74 = vector.shape_cast %67 : vector<1x16xi1> to vector<1x16xi1>
    %75 = vector.broadcast %74 : vector<1x16xi1> to vector<16x16xi1>
    %76 = vector.shape_cast %73 : vector<16x1xf32> to vector<16x1xf32>
    %77 = vector.broadcast %76 : vector<16x1xf32> to vector<16x16xf32>
    %78 = vector.broadcast %cst_48 : f32 to vector<16x16xf32>
    %79 = arith.select %75, %77, %78 : vector<16x16xi1>, vector<16x16xf32>
    %80 = arith.addf %49, %79 : vector<16x16xf32>
    %c2_i32_49 = arith.constant 2 : i32
    %c0_i32_50 = arith.constant 0 : i32
    %81 = arith.cmpi eq, %c2_i32_49, %c0_i32_50 : i32
    %c1_i32_51 = arith.constant 1 : i32
    %82 = arith.select %81, %c1_i32_51, %c2_i32_49 : i32
    %83 = vector.broadcast %82 : i32 to vector<1x16xi32>
    %84 = arith.remsi %48, %83 : vector<1x16xi32>
    %c0_i32_52 = arith.constant 0 : i32
    %85 = vector.broadcast %c0_i32_52 : i32 to vector<1x16xi32>
    %86 = arith.cmpi ne, %84, %85 : vector<1x16xi32>
    %c0_i32_53 = arith.constant 0 : i32
    %87 = vector.broadcast %c0_i32_53 : i32 to vector<1x16xi32>
    %88 = arith.cmpi slt, %84, %87 : vector<1x16xi32>
    %c0_i32_54 = arith.constant 0 : i32
    %89 = arith.cmpi slt, %82, %c0_i32_54 : i32
    %90 = vector.broadcast %89 : i1 to vector<1x16xi1>
    %91 = vector.broadcast %90 : vector<1x16xi1> to vector<1x16xi1>
    %92 = arith.xori %88, %91 : vector<1x16xi1>
    %93 = arith.andi %92, %86 : vector<1x16xi1>
    %94 = vector.broadcast %82 : i32 to vector<1x16xi32>
    %95 = arith.addi %84, %94 : vector<1x16xi32>
    %96 = arith.select %93, %95, %84 : vector<1x16xi1>, vector<1x16xi32>
    %c1_i32_55 = arith.constant 1 : i32
    %97 = vector.broadcast %c1_i32_55 : i32 to vector<1x16xi32>
    %98 = arith.cmpi eq, %96, %97 : vector<1x16xi32>
    %cst_56 = arith.constant -1.000000e+30 : f32
    %99 = vector.shape_cast %98 : vector<1x16xi1> to vector<1x16xi1>
    %100 = vector.broadcast %99 : vector<1x16xi1> to vector<16x16xi1>
    %101 = vector.broadcast %cst_56 : f32 to vector<16x16xf32>
    %102 = arith.select %100, %47, %101 : vector<16x16xi1>, vector<16x16xf32>
    %cst_57 = arith.constant dense<0xFF800000> : vector<16xf32>
    %103 = vector.multi_reduction <maximumf>, %102, %cst_57 [1] : vector<16x16xf32> to vector<16xf32>
    %104 = vector.shape_cast %103 : vector<16xf32> to vector<16x1xf32>
    %cst_58 = arith.constant 0.000000e+00 : f32
    %105 = vector.shape_cast %98 : vector<1x16xi1> to vector<1x16xi1>
    %106 = vector.broadcast %105 : vector<1x16xi1> to vector<16x16xi1>
    %107 = vector.shape_cast %104 : vector<16x1xf32> to vector<16x1xf32>
    %108 = vector.broadcast %107 : vector<16x1xf32> to vector<16x16xf32>
    %109 = vector.broadcast %cst_58 : f32 to vector<16x16xf32>
    %110 = arith.select %106, %108, %109 : vector<16x16xi1>, vector<16x16xf32>
    %111 = arith.addf %80, %110 : vector<16x16xf32>
    %112 = arith.subf %47, %111 : vector<16x16xf32>
    %113 = math.exp %112 : vector<16x16xf32>
    %c0_59 = arith.constant 0 : index
    %c0_60 = arith.constant 0 : index
    %114 = vector.load %arg22[%c0_59, %c0_60] : memref<16x16xf32, #tpu.memory_space<vmem>>, vector<16x16xf32>
    %cst_61 = arith.constant dense<0.000000e+00> : vector<16x16xf32>
    %115 = tpu.matmul %113, %114, %cst_61 {dimension_numbers = #tpu.dot_dimension_numbers<[1], [0], [0], [1], [0, 0, 1, 1], [], []>} : vector<16x16xf32>, vector<16x16xf32>, vector<16x16xf32> -> vector<16x16xf32>
    %116 = arith.divf %113, %115 : vector<16x16xf32>
    %c0_62 = arith.constant 0 : index
    %c0_63 = arith.constant 0 : index
    %117 = vector.load %arg23[%c0_62, %c0_63] : memref<16x8xf32, #tpu.memory_space<vmem>>, vector<16x8xf32>
    %cst_64 = arith.constant dense<0.000000e+00> : vector<16x8xf32>
    %118 = tpu.matmul %116, %117, %cst_64 {dimension_numbers = #tpu.dot_dimension_numbers<[1], [0], [0], [1], [0, 0, 1, 1], [], []>} : vector<16x16xf32>, vector<16x8xf32>, vector<16x8xf32> -> vector<16x8xf32>
    %cst_65 = arith.constant 5.000000e-01 : f32
    %119 = vector.broadcast %cst_65 : f32 to vector<16x1xf32>
    %120 = arith.cmpf ogt, %2, %119 : vector<16x1xf32>
    %cst_66 = arith.constant 0.000000e+00 : f32
    %121 = vector.shape_cast %120 : vector<16x1xi1> to vector<16x1xi1>
    %122 = vector.broadcast %121 : vector<16x1xi1> to vector<16x8xi1>
    %123 = vector.broadcast %cst_66 : f32 to vector<16x8xf32>
    %124 = arith.select %122, %123, %118 : vector<16x8xi1>, vector<16x8xf32>
    %c0_67 = arith.constant 0 : index
    %c0_68 = arith.constant 0 : index
    %125 = vector.load %arg24[%c0_67, %c0_68] : memref<16x128xf32, #tpu.memory_space<vmem>>, vector<16x128xf32>
    %cst_69 = arith.constant dense<0.000000e+00> : vector<16x128xf32>
    %126 = tpu.matmul %116, %125, %cst_69 {dimension_numbers = #tpu.dot_dimension_numbers<[1], [0], [0], [1], [0, 0, 1, 1], [], []>} : vector<16x16xf32>, vector<16x128xf32>, vector<16x128xf32> -> vector<16x128xf32>
    %127 = arith.mulf %126, %38 : vector<16x128xf32>
    %c0_70 = arith.constant 0 : index
    %c0_71 = arith.constant 0 : index
    %128 = vector.load %arg14[%c0_70, %c0_71] : memref<128x8xf32, #tpu.memory_space<vmem>>, vector<128x8xf32>
    %cst_72 = arith.constant dense<0.000000e+00> : vector<16x8xf32>
    %129 = tpu.matmul %127, %128, %cst_72 {dimension_numbers = #tpu.dot_dimension_numbers<[1], [0], [0], [1], [0, 0, 1, 1], [], []>} : vector<16x128xf32>, vector<128x8xf32>, vector<16x8xf32> -> vector<16x8xf32>
    %c0_73 = arith.constant 0 : index
    %c0_74 = arith.constant 0 : index
    %130 = vector.load %arg15[%c0_73, %c0_74] : memref<1x8xf32, #tpu.memory_space<vmem>>, vector<1x8xf32>
    %131 = vector.broadcast %130 : vector<1x8xf32> to vector<16x8xf32>
    %132 = arith.addf %129, %131 : vector<16x8xf32>
    %cst_75 = arith.constant 5.000000e-01 : f32
    %133 = vector.broadcast %cst_75 : f32 to vector<16x1xf32>
    %134 = arith.cmpf ogt, %2, %133 : vector<16x1xf32>
    %cst_76 = arith.constant 0.000000e+00 : f32
    %135 = vector.shape_cast %134 : vector<16x1xi1> to vector<16x1xi1>
    %136 = vector.broadcast %135 : vector<16x1xi1> to vector<16x8xi1>
    %137 = vector.broadcast %cst_76 : f32 to vector<16x8xf32>
    %138 = arith.select %136, %137, %132 : vector<16x8xi1>, vector<16x8xf32>
    %c0_77 = arith.constant 0 : index
    %c0_78 = arith.constant 0 : index
    %139 = vector.load %arg1[%c0_77, %c0_78] : memref<16x8xf32, #tpu.memory_space<vmem>>, vector<16x8xf32>
    %c0_79 = arith.constant 0 : index
    %c0_80 = arith.constant 0 : index
    %140 = vector.load %arg16[%c0_79, %c0_80] : memref<8x8xf32, #tpu.memory_space<vmem>>, vector<8x8xf32>
    %cst_81 = arith.constant dense<0.000000e+00> : vector<16x8xf32>
    %141 = tpu.matmul %139, %140, %cst_81 {dimension_numbers = #tpu.dot_dimension_numbers<[1], [0], [0], [1], [0, 0, 1, 1], [], []>} : vector<16x8xf32>, vector<8x8xf32>, vector<16x8xf32> -> vector<16x8xf32>
    %142 = arith.addf %138, %141 : vector<16x8xf32>
    %c0_82 = arith.constant 0 : index
    %c0_83 = arith.constant 0 : index
    %143 = vector.load %arg17[%c0_82, %c0_83] : memref<1x8xf32, #tpu.memory_space<vmem>>, vector<1x8xf32>
    %144 = vector.broadcast %143 : vector<1x8xf32> to vector<16x8xf32>
    %145 = arith.addf %142, %144 : vector<16x8xf32>
    %cst_84 = arith.constant 0.000000e+00 : f32
    %146 = vector.broadcast %cst_84 : f32 to vector<16x8xf32>
    %147 = arith.maximumf %145, %146 : vector<16x8xf32>
    %c0_85 = arith.constant 0 : index
    %c0_86 = arith.constant 0 : index
    %148 = vector.load %arg18[%c0_85, %c0_86] : memref<8x8xf32, #tpu.memory_space<vmem>>, vector<8x8xf32>
    %cst_87 = arith.constant dense<0.000000e+00> : vector<16x8xf32>
    %149 = tpu.matmul %147, %148, %cst_87 {dimension_numbers = #tpu.dot_dimension_numbers<[1], [0], [0], [1], [0, 0, 1, 1], [], []>} : vector<16x8xf32>, vector<8x8xf32>, vector<16x8xf32> -> vector<16x8xf32>
    %c0_88 = arith.constant 0 : index
    %c0_89 = arith.constant 0 : index
    %150 = vector.load %arg19[%c0_88, %c0_89] : memref<1x8xf32, #tpu.memory_space<vmem>>, vector<1x8xf32>
    %151 = vector.broadcast %150 : vector<1x8xf32> to vector<16x8xf32>
    %152 = arith.addf %149, %151 : vector<16x8xf32>
    %c0_90 = arith.constant 0 : index
    %c0_91 = arith.constant 0 : index
    %153 = vector.load %arg25[%c0_90, %c0_91] : memref<16x8xf32, #tpu.memory_space<vmem>>, vector<16x8xf32>
    tpu.vector_store %arg25[%c0_90, %c0_91], %152 {strides = array<i32>} : memref<16x8xf32, #tpu.memory_space<vmem>>, vector<16x8xf32>,
    %c0_92 = arith.constant 0 : index
    %c0_93 = arith.constant 0 : index
    %154 = vector.load %arg26[%c0_92, %c0_93] : memref<16x8xf32, #tpu.memory_space<vmem>>, vector<16x8xf32>
    tpu.vector_store %arg26[%c0_92, %c0_93], %124 {strides = array<i32>} : memref<16x8xf32, #tpu.memory_space<vmem>>, vector<16x8xf32>,
    return
  }
  func.func @transform_0(%arg0: i32) -> (i32, i32) {
    %c0_i32 = arith.constant 0 : i32
    %c0_i32_0 = arith.constant 0 : i32
    return %arg0, %c0_i32 : i32, i32
  }
  func.func @transform_1(%arg0: i32) -> (i32, i32) {
    %c0_i32 = arith.constant 0 : i32
    %c0_i32_0 = arith.constant 0 : i32
    return %arg0, %c0_i32 : i32, i32
  }
  func.func @transform_2(%arg0: i32) -> (i32, i32) {
    %c0_i32 = arith.constant 0 : i32
    %c0_i32_0 = arith.constant 0 : i32
    return %arg0, %c0_i32 : i32, i32
  }
  func.func @transform_3(%arg0: i32) -> (i32, i32) {
    %c0_i32 = arith.constant 0 : i32
    %c0_i32_0 = arith.constant 0 : i32
    return %arg0, %c0_i32 : i32, i32
  }
  func.func @transform_4(%arg0: i32) -> (i32, i32) {
    %c0_i32 = arith.constant 0 : i32
    %c0_i32_0 = arith.constant 0 : i32
    return %arg0, %c0_i32 : i32, i32
  }
  func.func @transform_5(%arg0: i32) -> (i32, i32) {
    %c0_i32 = arith.constant 0 : i32
    %c0_i32_0 = arith.constant 0 : i32
    return %arg0, %c0_i32 : i32, i32
  }
  func.func @transform_6(%arg0: i32) -> (i32, i32) {
    %c0_i32 = arith.constant 0 : i32
    %c0_i32_0 = arith.constant 0 : i32
    %c0_i32_1 = arith.constant 0 : i32
    return %c0_i32, %c0_i32_0 : i32, i32
  }
  func.func @transform_7(%arg0: i32) -> (i32, i32) {
    %c0_i32 = arith.constant 0 : i32
    %c0_i32_0 = arith.constant 0 : i32
    %c0_i32_1 = arith.constant 0 : i32
    return %c0_i32, %c0_i32_0 : i32, i32
  }
  func.func @transform_8(%arg0: i32) -> (i32, i32) {
    %c0_i32 = arith.constant 0 : i32
    %c0_i32_0 = arith.constant 0 : i32
    %c0_i32_1 = arith.constant 0 : i32
    return %c0_i32, %c0_i32_0 : i32, i32
  }
  func.func @transform_9(%arg0: i32) -> (i32, i32) {
    %c0_i32 = arith.constant 0 : i32
    %c0_i32_0 = arith.constant 0 : i32
    %c0_i32_1 = arith.constant 0 : i32
    return %c0_i32, %c0_i32_0 : i32, i32
  }
  func.func @transform_10(%arg0: i32) -> (i32, i32) {
    %c0_i32 = arith.constant 0 : i32
    %c0_i32_0 = arith.constant 0 : i32
    %c0_i32_1 = arith.constant 0 : i32
    return %c0_i32, %c0_i32_0 : i32, i32
  }
  func.func @transform_11(%arg0: i32) -> (i32, i32) {
    %c0_i32 = arith.constant 0 : i32
    %c0_i32_0 = arith.constant 0 : i32
    %c0_i32_1 = arith.constant 0 : i32
    return %c0_i32, %c0_i32_0 : i32, i32
  }
  func.func @transform_12(%arg0: i32) -> (i32, i32) {
    %c0_i32 = arith.constant 0 : i32
    %c0_i32_0 = arith.constant 0 : i32
    %c0_i32_1 = arith.constant 0 : i32
    return %c0_i32, %c0_i32_0 : i32, i32
  }
  func.func @transform_13(%arg0: i32) -> (i32, i32) {
    %c0_i32 = arith.constant 0 : i32
    %c0_i32_0 = arith.constant 0 : i32
    %c0_i32_1 = arith.constant 0 : i32
    return %c0_i32, %c0_i32_0 : i32, i32
  }
  func.func @transform_14(%arg0: i32) -> (i32, i32) {
    %c0_i32 = arith.constant 0 : i32
    %c0_i32_0 = arith.constant 0 : i32
    %c0_i32_1 = arith.constant 0 : i32
    return %c0_i32, %c0_i32_0 : i32, i32
  }
  func.func @transform_15(%arg0: i32) -> (i32, i32) {
    %c0_i32 = arith.constant 0 : i32
    %c0_i32_0 = arith.constant 0 : i32
    %c0_i32_1 = arith.constant 0 : i32
    return %c0_i32, %c0_i32_0 : i32, i32
  }
  func.func @transform_16(%arg0: i32) -> (i32, i32) {
    %c0_i32 = arith.constant 0 : i32
    %c0_i32_0 = arith.constant 0 : i32
    %c0_i32_1 = arith.constant 0 : i32
    return %c0_i32, %c0_i32_0 : i32, i32
  }
  func.func @transform_17(%arg0: i32) -> (i32, i32) {
    %c0_i32 = arith.constant 0 : i32
    %c0_i32_0 = arith.constant 0 : i32
    %c0_i32_1 = arith.constant 0 : i32
    return %c0_i32, %c0_i32_0 : i32, i32
  }
  func.func @transform_18(%arg0: i32) -> (i32, i32) {
    %c0_i32 = arith.constant 0 : i32
    %c0_i32_0 = arith.constant 0 : i32
    %c0_i32_1 = arith.constant 0 : i32
    return %c0_i32, %c0_i32_0 : i32, i32
  }
  func.func @transform_19(%arg0: i32) -> (i32, i32) {
    %c0_i32 = arith.constant 0 : i32
    %c0_i32_0 = arith.constant 0 : i32
    %c0_i32_1 = arith.constant 0 : i32
    return %c0_i32, %c0_i32_0 : i32, i32
  }
  func.func @transform_20(%arg0: i32) -> (i32, i32) {
    %c0_i32 = arith.constant 0 : i32
    %c0_i32_0 = arith.constant 0 : i32
    %c0_i32_1 = arith.constant 0 : i32
    return %c0_i32, %c0_i32_0 : i32, i32
  }
  func.func @transform_21(%arg0: i32) -> (i32, i32) {
    %c0_i32 = arith.constant 0 : i32
    %c0_i32_0 = arith.constant 0 : i32
    %c0_i32_1 = arith.constant 0 : i32
    return %c0_i32, %c0_i32_0 : i32, i32
  }
  func.func @transform_22(%arg0: i32) -> (i32, i32) {
    %c0_i32 = arith.constant 0 : i32
    %c0_i32_0 = arith.constant 0 : i32
    %c0_i32_1 = arith.constant 0 : i32
    return %c0_i32, %c0_i32_0 : i32, i32
  }
  func.func @transform_23(%arg0: i32) -> (i32, i32) {
    %c0_i32 = arith.constant 0 : i32
    %c0_i32_0 = arith.constant 0 : i32
    %c0_i32_1 = arith.constant 0 : i32
    return %c0_i32, %c0_i32_0 : i32, i32
  }
  func.func @transform_24(%arg0: i32) -> (i32, i32) {
    %c0_i32 = arith.constant 0 : i32
    %c0_i32_0 = arith.constant 0 : i32
    return %arg0, %c0_i32 : i32, i32
  }
  func.func @transform_25(%arg0: i32) -> (i32, i32) {
    %c0_i32 = arith.constant 0 : i32
    %c0_i32_0 = arith.constant 0 : i32
    return %arg0, %c0_i32 : i32, i32
  }
}

</mosaic_0001>

<bundles_post_ra>
// kernel: tpu_custom_call.1
= control target key start
LH: loop header
LB: loop body
LE: loop exit
PB: predicated region body
PF: predicated region fallthrough
CT: control target
= control target key end

     0   :  { %s4008_s0 = inlined_call_operand.vmem [shape: f32[32,8], index: 0, kind: input, shape index: {}]   ;;  %s4009_s1 = inlined_call_operand.vmem [shape: f32[32,8], index: 1, kind: input, shape index: {}]   ;;  %s4010_s2 = inlined_call_operand.vmem [shape: f32[32,64], index: 2, kind: input, shape index: {}]   ;;  %s4011_s3 = inlined_call_operand.hbm [shape: f32[32,64], index: 3, kind: input, shape index: {}]   ;;  %s4012_s4 = inlined_call_operand.hbm [shape: f32[32,64], index: 4, kind: input, shape index: {}]   ;;  %s4013_s5 = inlined_call_operand.vmem [shape: f32[32,8], index: 5, kind: input, shape index: {}]   ;;  %s4014_s6 = inlined_call_operand.hbm [shape: f32[8,128], index: 6, kind: input, shape index: {}]   ;;  %s4015_s7 = inlined_call_operand.hbm [shape: f32[8,128], index: 7, kind: input, shape index: {}]   ;;  %s4016_s8 = inlined_call_operand.vmem [shape: f32[1,128], index: 8, kind: input, shape index: {}]   ;;  %s4017_s9 = inlined_call_operand.vmem [shape: f32[64,256], index: 9, kind: input, shape index: {}]   ;;  %s4018_s10 = inlined_call_operand.vmem [shape: f32[64,256], index: 10, kind: input, shape index: {}]   ;;  %s4019_s11 = inlined_call_operand.vmem [shape: f32[64,256], index: 11, kind: input, shape index: {}]   ;;  %s4020_s12 = inlined_call_operand.hbm [shape: f32[1,256], index: 12, kind: input, shape index: {}]   ;;  %s4021_s13 = inlined_call_operand.vmem [shape: f32[128,8], index: 13, kind: input, shape index: {}]   ;;  %s4022_s14 = inlined_call_operand.vmem [shape: f32[1,8], index: 14, kind: input, shape index: {}]   ;;  %s4023_s15 = inlined_call_operand.hbm [shape: f32[8,8], index: 15, kind: input, shape index: {}]   ;;  %s4024_s16 = inlined_call_operand.vmem [shape: f32[1,8], index: 16, kind: input, shape index: {}]   ;;  %s4025_s17 = inlined_call_operand.vmem [shape: f32[8,8], index: 17, kind: input, shape index: {}]   ;;  %s4026_s18 = inlined_call_operand.vmem [shape: f32[1,8], index: 18, kind: input, shape index: {}]   ;;  %s4027_s19 = inlined_call_operand.vmem [shape: f32[128,16], index: 19, kind: input, shape index: {}]   ;;  %s4028_s20 = inlined_call_operand.vmem [shape: f32[8,16], index: 20, kind: input, shape index: {}]   ;;  %s4029_s21 = inlined_call_operand.vmem [shape: f32[16,16], index: 21, kind: input, shape index: {}]   ;;  %s4030_s22 = inlined_call_operand.vmem [shape: f32[16,8], index: 22, kind: input, shape index: {}]   ;;  %s4031_s23 = inlined_call_operand.vmem [shape: f32[16,128], index: 23, kind: input, shape index: {}]   ;;  %s4032_s24 = inlined_call_operand.vmem [shape: f32[32,8], index: 24, kind: output, shape index: {0}]   ;;  %s4033_s25 = inlined_call_operand.vmem [shape: f32[32,8], index: 25, kind: output, shape index: {1}]  }
   0x1   :  { %4048 = sst [smem:[#allocation17_spill]] %s4008_s0 }
   0x2   :  { %4049 = sst [smem:[#allocation18_spill]] %s4009_s1 }
   0x3   :  { %4050 = sst [smem:[#allocation19_spill]] %s4010_s2 }
   0x4   :  { %4051 = sst [smem:[#allocation20_spill]] %s4011_s3 }
   0x5   :  { %4052 = sst [smem:[#allocation21_spill]] %s4012_s4 }
   0x6   :  { %4053 = sst [smem:[#allocation22_spill]] %s4013_s5 }
   0x7   :  { %4054 = sst [smem:[#allocation23_spill]] %s4014_s6 }
   0x8   :  { %4055 = sst [smem:[#allocation24_spill]] %s4015_s7 }
   0x9   :  { %4056 = sst [smem:[#allocation25_spill]] %s4016_s8 }
   0xa   :  { %4057 = sst [smem:[#allocation26_spill]] %s4017_s9 }
   0xb   :  { %4058 = sst [smem:[#allocation27_spill]] %s4020_s12 }
   0xc   :  { %4059 = sst [smem:[#allocation28_spill]] %s4021_s13 }
   0xd   :  { %4060 = sst [smem:[#allocation29_spill]] %s4022_s14 }
   0xe   :  { %4061 = sst [smem:[#allocation30_spill]] %s4023_s15 }
   0xf   :  { %4062 = sst [smem:[#allocation31_spill]] %s4024_s16 }
  0x10   :  { %4063 = sst [smem:[#allocation32_spill]] %s4025_s17 }
  0x11   :  { %4064 = sst [smem:[#allocation33_spill]] %s4026_s18 }
  0x12   :  { %4065 = sst [smem:[#allocation34_spill]] %s4031_s23 }
  0x13   :  { %4066 = sst [smem:[#allocation35_spill]] %s4032_s24 }
  0x14   :  { %4067 = sst [smem:[#allocation36_spill]] %s4033_s25 }
  0x15   :  { %31 = vsyncpa [#allocation3], 0 }
  0x16   :  { %33 = vsyncpa [#allocation3 + $0x1], 0 }
  0x17   :  { %34 = vsyncpa [#allocation5], 0 }
  0x18   :  { %36 = vsyncpa [#allocation5 + $0x1], 0 }
  0x19   :  { %37 = vsyncpa [#allocation8], 0 }
  0x1a   :  { %38 = vsyncpa [#allocation11], 0  ;;  %s3311_s29 = smov 0   ;;  %s3313_s2 = smov 0  }
  0x1b   :  { %s3315_s6 = smov 0   ;;  %s3317_s30 = smov 0  }
  0x1c LB: > { %s3330_s7 = sadd.s32 4294967295, %s3170_s30   ;;  %p142_p0 = scmp.ne.s32.totalorder %s3162_s2, %s3158_s29  ;;  %s3170_s30 = sphi %s3317_s30, %s4110_s30   ;;  %s3166_s6 = sphi %s3315_s6, %s4109_s6   ;;  %s3162_s2 = sphi %s3313_s2, %s4108_s2   ;;  %s3158_s29 = sphi %s3311_s29, %s4107_s29  }
  0x1d   : > { %p4039_p1 = scmp.eq.s32.totalorder %s3330_s7, 0  ;;  %p2478_p2 = scmp.ge.s32.totalorder %s3170_s30, 1 }
  0x1e   : > { %p635_p3 = scmp.lt.s32.totalorder %s3170_s30, 3  ;;  %s3172_s1 = smov [#allocation6]  }
  0x1f   : > { %p3338_p4 = por %p4039_p1, %p142_p0  ;;  %s648_s8 = sshll.u32 %s3172_s1, 4  ;;  %s649_s8 = int_to_ptr.vmem [resolvable:$true] %s648_s8 }
  0x20   : > { %p3342_p5 = pnand %p2478_p2, %p635_p3  ;;  %s3173_s27 = smov [#allocation7]  }
  0x21   : > { %s4068_s3 = scalar_select %p3338_p4, 1, 0 }
  0x22   : > { %s4069_s26 = scalar_select %p3342_p5, 1, 0 }
  0x23   : > { %p2872_p6 = pneg %p3342_p5  ;;  %s659_s4 = sshll.u32 %s3173_s27, 4  ;;  %s3354_s4 = int_to_ptr.vmem [resolvable:$true] %s659_s4 }
  0x24   : > { %s3174_s9 = smov [#allocation9]   ;;  %s4071_s1 = sld [smem:[#allocation23_spill]] }
  0x25   : > { %p3350_p7 = pnand %p2872_p6, %p4039_p1  ;;  %s682_s5 = sshll.u32 %s3174_s9, 4  ;;  %s3356_s5 = int_to_ptr.vmem [resolvable:$true] %s682_s5 }
  0x27   : > { %p3366_p9 = pneg %p3350_p7 }
  0x2a   : > { %s2948_s24 = scalar_lea.hbm %s4071_s1, 128 }
  0x2b   : > { %p2949_p8 = scmp.ne.s32.totalorder %s4071_s1, %s2948_s24  ;;  %p2955_p12 = scmp.lt.u32.totalorder %s2948_s24, %s4071_s1 }
  0x2d   : > { %p2951_p10 = pnand %p3366_p9, %p2949_p8 }
  0x2f   : > { %p2952_p11 = pneg %p2951_p10 }
  0x31   : > { %p2957_p13 = pnand %p2955_p12, %p2952_p11 }
  0x33   : > { %2960 = shalt.err (!%p2957_p13)
}
  0x34   : > { %s2961_s0 = scalar_lea.vmem %s649_s8, 128  ;;  %p2969_p6 = scmp.lt.s32.totalorder %s649_s8, %s649_s8 }
  0x35   : > { %p2962_p0 = scmp.ne.s32.totalorder %s649_s8, %s2961_s0  ;;  %p2970_p1 = scmp.lt.s32.totalorder %s2961_s0, %s2961_s0 }
  0x37   : > { %p2964_p2 = pnand %p2962_p0, %p3366_p9  ;;  %p2971_p4 = por %p2970_p1, %p2969_p6 }
  0x39   : > { %p2965_p3 = pneg %p2964_p2 }
  0x3b   : > { %p2972_p5 = pnand %p2971_p4, %p2965_p3 }
  0x3d   : > { %2975 = shalt.err (!%p2972_p5)
}
  0x3e   : > { %2875 = dma.hbm_to_vmem [thread:$0]  (!%p3350_p7), %s4071_s1, 128, %s649_s8, [#allocation5]  }
  0x3f   : > { %s4073_s29 = sld [smem:[#allocation24_spill]] }
  0x45   : > { %s4074_s9 = smov %s4073_s29  ;;  %s2976_s17 = scalar_lea.hbm %s4073_s29, 128 }
  0x46   : > { %p2977_p8 = scmp.ne.s32.totalorder %s4074_s9, %s2976_s17  ;;  %p2983_p4 = scmp.lt.u32.totalorder %s2976_s17, %s4074_s9 }
  0x48   : > { %p2979_p10 = pnand %p2977_p8, %p3366_p9 }
  0x4a   : > { %p2980_p1 = pneg %p2979_p10 }
  0x4c   : > { %p2985_p5 = pnand %p2983_p4, %p2980_p1 }
  0x4e   : > { %2988 = shalt.err (!%p2985_p5)
}
  0x4f   : > { %s2989_s8 = scalar_lea.vmem %s3354_s4, 128  ;;  %p2997_p0 = scmp.lt.s32.totalorder %s3354_s4, %s3354_s4 }
  0x50   : > { %p2990_p11 = scmp.ne.s32.totalorder %s3354_s4, %s2989_s8  ;;  %p2998_p2 = scmp.lt.s32.totalorder %s2989_s8, %s2989_s8 }
  0x52   : > { %p2992_p12 = pnand %p2990_p11, %p3366_p9  ;;  %p2999_p3 = por %p2998_p2, %p2997_p0 }
  0x54   : > { %p2993_p13 = pneg %p2992_p12 }
  0x56   : > { %p3000_p6 = pnand %p2999_p3, %p2993_p13 }
  0x58   : > { %3003 = shalt.err (!%p3000_p6)
}
  0x59   : > { %2878 = dma.hbm_to_vmem [thread:$0]  (!%p3350_p7), %s4074_s9, 128, %s3354_s4, [#allocation8]  }
  0x5a   : > { %s4075_s12 = sld [smem:[#allocation27_spill]] }
  0x60   : > { %s3004_s16 = scalar_lea.hbm %s4075_s12, 32 }
  0x61   : > { %p3005_p8 = scmp.ne.s32.totalorder %s4075_s12, %s3004_s16  ;;  %p3011_p4 = scmp.lt.u32.totalorder %s3004_s16, %s4075_s12 }
  0x63   : > { %p3007_p10 = pnand %p3005_p8, %p3366_p9 }
  0x65   : > { %p3008_p1 = pneg %p3007_p10 }
  0x67   : > { %p3013_p5 = pnand %p3011_p4, %p3008_p1 }
  0x69   : > { %3016 = shalt.err (!%p3013_p5)
}
  0x6a   : > { %s3017_s4 = scalar_lea.vmem %s3356_s5, 32  ;;  %p3025_p0 = scmp.lt.s32.totalorder %s3356_s5, %s3356_s5 }
  0x6b   : > { %p3018_p11 = scmp.ne.s32.totalorder %s3356_s5, %s3017_s4  ;;  %p3026_p2 = scmp.lt.s32.totalorder %s3017_s4, %s3017_s4 }
  0x6d   : > { %p3020_p12 = pnand %p3018_p11, %p3366_p9  ;;  %p3027_p3 = por %p3026_p2, %p3025_p0 }
  0x6f   : > { %p3021_p13 = pneg %p3020_p12 }
  0x71   : > { %p3028_p6 = pnand %p3027_p3, %p3021_p13 }
  0x73   : > { %3031 = shalt.err (!%p3028_p6)
}
  0x74   : > { %2881 = dma.hbm_to_vmem [thread:$0]  (!%p3350_p7), %s4075_s12, 32, %s3356_s5, [#allocation8]  }
  0x75   : > { %s3175_s13 = smov [#allocation10]   ;;  %s4076_s15 = sld [smem:[#allocation30_spill]] }
  0x76   : > { %s699_s17 = sshll.u32 %s3175_s13, 4  ;;  %s700_s17 = int_to_ptr.vmem [resolvable:$true] %s699_s17 }
  0x7b   : > { %s3032_s16 = scalar_lea.hbm %s4076_s15, 128 }
  0x7c   : > { %p3033_p8 = scmp.ne.s32.totalorder %s4076_s15, %s3032_s16  ;;  %p3039_p4 = scmp.lt.u32.totalorder %s3032_s16, %s4076_s15 }
  0x7e   : > { %p3035_p10 = pnand %p3033_p8, %p3366_p9 }
  0x80   : > { %p3036_p1 = pneg %p3035_p10 }
  0x82   : > { %p3041_p5 = pnand %p3039_p4, %p3036_p1 }
  0x84   : > { %3044 = shalt.err (!%p3041_p5)
}
  0x85   : > { %s3045_s5 = scalar_lea.vmem %s700_s17, 128  ;;  %p3053_p0 = scmp.lt.s32.totalorder %s700_s17, %s700_s17 }
  0x86   : > { %p3046_p11 = scmp.ne.s32.totalorder %s700_s17, %s3045_s5  ;;  %p3054_p2 = scmp.lt.s32.totalorder %s3045_s5, %s3045_s5 }
  0x88   : > { %p3048_p12 = pnand %p3046_p11, %p3366_p9  ;;  %p3055_p3 = por %p3054_p2, %p3053_p0 }
  0x8a   : > { %p3049_p13 = pneg %p3048_p12 }
  0x8c   : > { %p3056_p6 = pnand %p3055_p3, %p3049_p13 }
  0x8e   : > { %3059 = shalt.err (!%p3056_p6)
}
  0x8f   : > { %2884 = dma.hbm_to_vmem [thread:$0]  (!%p3350_p7), %s4076_s15, 128, %s700_s17, [#allocation11]  }
  0x90   : > { %s3447_s27 = sadd.s32 1, %s3170_s30   ;;  %s129_s8 = sadd.s32 1, %s3166_s6 }
  0x91   : > { %s126_s28 = ssub.s32 %s3170_s30, %s3447_s27  ;;  %p136_p9 = scmp.ne.s32.totalorder %s3166_s6, %s3162_s2 }
  0x92   : > { %p127_p8 = scmp.eq.s32.totalorder %s126_s28, 0  ;;  %p137_p10 = scmp.eq.s32.totalorder %s3170_s30, 0 }
  0x93   : > { %p2896_p1 = scmp.lt.s32.totalorder %s3170_s30, 2  ;;  %s761_s13 = sand.u32 1, %s3166_s6  }
  0x94   : > { %s3458_s23 = scalar_select %p127_p8, %s3166_s6, %s129_s8  }
  0x95   : > { %p138_p4 = por %p137_p10, %p136_p9  ;;  %s3460_s25 = sshll.u32 %s761_s13, 4 }
  0x96   : > { %s4044_s16 = sshll.u32 %s3170_s30, 8  ;;  %s4077_s14 = sld [smem:[#allocation20_spill]] }
  0x97   : > { %s765_s29 = scalar_lea.vmem [#allocation2], %s3460_s25  ;;  %p3471_p7 = pnand %p2896_p1, %p138_p4 }
  0x98   : > { %s772_s5 = sshll.u32 %s765_s29, 4  ;;  %s3477_s0 = scalar_lea.sflag [#allocation3], %s761_s13  ;;  %s3475_s5 = int_to_ptr.vmem [resolvable:$true] %s772_s5 }
  0x99   : > { %p3062_p11 = pneg %p3471_p7 }
  0x9c   : > { %s3468_s24 = scalar_lea.hbm %s4077_s14, %s4044_s16  ;;  %s3065_s17 = scalar_lea.hbm %s4077_s14, 512 }
  0x9d   : > { %s3060_s8 = scalar_lea.hbm %s3468_s24, 256  ;;  %p3066_p0 = scmp.lt.u32.totalorder %s3468_s24, %s4077_s14 }
  0x9e   : > { %p3061_p5 = scmp.ne.s32.totalorder %s3468_s24, %s3060_s8  ;;  %p3067_p2 = scmp.lt.u32.totalorder %s3065_s17, %s3060_s8 }
  0x9f   : > { %p3069_p6 = scmp.lt.u32.totalorder %s3060_s8, %s3468_s24 }
  0xa0   : > { %p3063_p12 = pnand %p3062_p11, %p3061_p5  ;;  %p3068_p3 = por %p3067_p2, %p3066_p0 }
  0xa2   : > { %p3064_p13 = pneg %p3063_p12  ;;  %p3070_p9 = por %p3069_p6, %p3068_p3 }
  0xa4   : > { %p3071_p8 = pnand %p3070_p9, %p3064_p13 }
  0xa6   : > { %3074 = shalt.err (!%p3071_p8)
}
  0xa7   : > { %s3075_s13 = scalar_lea.vmem %s3475_s5, 256  ;;  %s3176_s28 = smov [#allocation2]  }
  0xa8   : > { %p3076_p10 = scmp.ne.s32.totalorder %s3475_s5, %s3075_s13  ;;  %s3080_s18 = sshll.u32 %s3176_s28, 4  ;;  %s3081_s18 = int_to_ptr.vmem [resolvable:$false] %s3080_s18 }
  0xa9   : > { %s3082_s16 = scalar_lea.vmem %s3081_s18, 512  ;;  %p3083_p5 = scmp.lt.s32.totalorder %s3475_s5, %s3081_s18 }
  0xaa   : > { %p3078_p1 = pnand %p3076_p10, %p3062_p11  ;;  %p3084_p12 = scmp.lt.s32.totalorder %s3082_s16, %s3075_s13 }
  0xac   : > { %p3079_p4 = pneg %p3078_p1  ;;  %p3085_p0 = por %p3084_p12, %p3083_p5 }
  0xae   : > { %p3086_p2 = pnand %p3085_p0, %p3079_p4 }
  0xb0   : > { %3089 = shalt.err (!%p3086_p2)
}
  0xb1   : > { %s3177_s8 = smov 128   ;;  %s3178_s17 = smov 8  }
  0xb2   : > { %2888 = dma.hbm_to_vmem [thread:$0]  (!%p3471_p7), %s3468_s24, 256, %s3475_s5, %s3477_s0, %s3177_s8, %s3177_s8, %s3178_s17  }
  0xb3   : > { %s4079_s29 = sshll.u32 %s3170_s30, 8  ;;  %s4080_s18 = sld [smem:[#allocation21_spill]] }
  0xb4   : > { %s786_s1 = scalar_lea.vmem [#allocation4], %s3460_s25  ;;  %s782_s12 = sand.u32 1, %s3170_s30  }
  0xb5   : > { %s793_s9 = sshll.u32 %s786_s1, 4  ;;  %s3519_s14 = scalar_lea.sflag [#allocation5], %s782_s12  ;;  %s3517_s9 = int_to_ptr.vmem [resolvable:$true] %s793_s9 }
  0xb9   : > { %s3513_s16 = scalar_lea.hbm %s4080_s18, %s4079_s29  ;;  %s3095_s0 = scalar_lea.hbm %s4080_s18, 512 }
  0xba   : > { %s3090_s15 = scalar_lea.hbm %s3513_s16, 256  ;;  %p3096_p9 = scmp.lt.u32.totalorder %s3513_s16, %s4080_s18 }
  0xbb   : > { %p3091_p13 = scmp.ne.s32.totalorder %s3513_s16, %s3090_s15  ;;  %p3097_p8 = scmp.lt.u32.totalorder %s3095_s0, %s3090_s15 }
  0xbc   : > { %p3099_p1 = scmp.lt.u32.totalorder %s3090_s15, %s3513_s16 }
  0xbd   : > { %p3093_p3 = pnand %p3091_p13, %p3062_p11  ;;  %p3098_p10 = por %p3097_p8, %p3096_p9 }
  0xbf   : > { %p3094_p6 = pneg %p3093_p3  ;;  %p3100_p4 = por %p3099_p1, %p3098_p10 }
  0xc1   : > { %p3101_p5 = pnand %p3100_p4, %p3094_p6 }
  0xc3   : > { %3104 = shalt.err (!%p3101_p5)
}
  0xc4   : > { %s3105_s12 = scalar_lea.vmem %s3517_s9, 256  ;;  %s3179_s30 = smov [#allocation4]  }
  0xc5   : > { %p3106_p12 = scmp.ne.s32.totalorder %s3517_s9, %s3105_s12  ;;  %s3110_s1 = sshll.u32 %s3179_s30, 4  ;;  %s3111_s1 = int_to_ptr.vmem [resolvable:$false] %s3110_s1 }
  0xc6   : > { %s3112_s25 = scalar_lea.vmem %s3111_s1, 512  ;;  %p3113_p13 = scmp.lt.s32.totalorder %s3517_s9, %s3111_s1 }
  0xc7   : > { %p3108_p0 = pnand %p3106_p12, %p3062_p11  ;;  %p3114_p3 = scmp.lt.s32.totalorder %s3112_s25, %s3105_s12 }
  0xc9   : > { %p3109_p2 = pneg %p3108_p0  ;;  %p3115_p9 = por %p3114_p3, %p3113_p13 }
  0xcb   : > { %p3116_p8 = pnand %p3115_p9, %p3109_p2 }
  0xcd   : > { %3119 = shalt.err (!%p3116_p8)
}
  0xce   : > { %2891 = dma.hbm_to_vmem [thread:$0]  (!%p3471_p7), %s3513_s16, 256, %s3517_s9, %s3519_s14, %s3177_s8, %s3177_s8, %s3178_s17  }
  0xcf   : > { %p4081_p11 = scmp.ne.s32.totalorder %s4069_s26, 0 }
  0xd0   : > { %s816_s15 = sand.u32 (!%p4081_p11), 1, %s3162_s2   ;;  %p4082_p6 = scmp.ne.s32.totalorder (!%p4081_p11), %s4068_s3, 0 }
  0xd1   : > { %814 = sbr.rel (%p4081_p11) target bundleno = 1771 (0x6eb), region = 116  ;;  %s3551_s28 = sshll.u32 (!%p4081_p11), %s816_s15, 4 }
  0xd2   : > { %s817_s24 = scalar_lea.sflag (!%p4081_p11), [#allocation3], %s816_s15  ;;  %s820_s5 = scalar_lea.vmem (!%p4081_p11), [#allocation2], %s3551_s28 }
  0xd8   : > { %3137 = dma.done.wait (%p4082_p6), %s817_s24, 256  }
  0xd9   : > { %3139 = vsyncadd (%p4082_p6), %s817_s24, 4294967040  ;;  %s825_s9 = sand.u32 1, %s3330_s7   ;;  %s829_s26 = scalar_lea.vmem [#allocation4], %s3551_s28 }
  0xda   : > { %s826_s14 = scalar_lea.sflag [#allocation5], %s825_s9 }
  0xdb   : > { %3141 = dma.done.wait (%p4082_p6), %s826_s14, 256  }
  0xdc   : > { %3143 = vsyncadd (%p4082_p6), %s826_s14, 4294967040  ;;  %p4083_p7 = scmp.eq.s32.totalorder %s3330_s7, 0 }
  0xde   : > { %3145 = dma.done.wait (%p4083_p7), [#allocation5], 128   ;;  %p4084_p10 = pmov %p4083_p7 }
  0xdf   : > { %p4085_p1 = pmov %p4083_p7 }
  0xe0   : > { %3147 = vsyncadd (%p4084_p10), [#allocation5], 4294967168 }
  0xe1   : > { %3149 = dma.done.wait (%p4085_p1), [#allocation8], 160   ;;  %p4086_p4 = pmov %p4085_p1 }
  0xe2   : > { %p4087_p5 = pmov %p4085_p1 }
  0xe3   : > { %3151 = vsyncadd (%p4086_p4), [#allocation8], 4294967136 }
  0xe4   : > { %3153 = dma.done.wait (%p4087_p5), [#allocation11], 128   ;;  %p4088_p12 = pmov %p4085_p1 }
  0xe5   : > { %s2497_s3 = sshll.u32 %s3330_s7, 1  ;;  %s4089_s16 = sld [smem:[#allocation18_spill]]  ;;  %vm982_vm0 = vcmask 64512   ;;  %v1009_v0 = vld [vmem:[#allocation7] sm:$0xff]  ;;  %v1006_v1 = vld [vmem:[#allocation6] sm:$0xff]  ;;  %v3180_v19 = vmov 0.0  }
  0xe6   : > { %3155 = vsyncadd (%p4088_p12), [#allocation11], 4294967168  ;;  %p943_p0 = scmp.lt.s32.totalorder %s2497_s3, 3  ;;  %s4090_s12 = sld [smem:[#allocation17_spill]]  ;;  %2602 = vmatprep.subr.mxu1 %v1009_v0  ;;  %2607 = vmatprep.subr.mxu0 %v1006_v1  ;;  %v1202_v25 = vld [vmem:[%s4018_s10 + $0x8] sm:$0xff]  ;;  %v1204_v26 = vld [vmem:[%s4018_s10 + $0x18] sm:$0xff] }
  0xe7   : > { %2603 = vmatpush3.msra.mxu1 %v1009_v0  ;;  %s4091_s25 = sld [smem:[#allocation26_spill]]  ;;  %2608 = vmatpush3.msra.mxu0 %v1006_v1  ;;  %v2718_v28 = vpack.c.bf16 %v1204_v26, %v1202_v25  ;;  %v1201_v29 = vld [vmem:[%s4018_s10] sm:$0xff]  ;;  %v1203_v30 = vld [vmem:[%s4018_s10 + $0x10] sm:$0xff]  ;;  %v1206_v34 = vld [vmem:[%s4018_s10 + $0x28] sm:$0xff]  ;;  %s4093_s17 = sld [smem:[#allocation22_spill]]  ;;  %vm1217_vm1 = vcmask 523264  }
  0xe8   : > { %s4112_s3 = smov (!%p943_p0, %s2497_s3), 3  ;;  %v2720_v31 = vpack.c.bf16 %v1203_v30, %v1201_v29  ;;  %v1208_v35 = vld [vmem:[%s4018_s10 + $0x38] sm:$0xff]  ;;  %v1205_v39 = vld [vmem:[%s4018_s10 + $0x20] sm:$0xff]  ;;  %v1207_v40 = vld [vmem:[%s4018_s10 + $0x30] sm:$0xff]  ;;  %vm1701_vm9 = vcmask 130048   ;;  %s4102_s15 = sld [smem:[#allocation32_spill]] }
  0xe9   : > { %s3577_s4 = sshll.u32 %s4112_s3, 3  ;;  %2719 = vmatprep.subr.bf16.mxu0 %v2718_v28  ;;  %v2722_v38 = vpack.c.bf16 %v1208_v35, %v1206_v34  ;;  %v1387_v41 = vld [vmem:[%s4019_s11 + $0x8] sm:$0xff]  ;;  %v1389_v42 = vld [vmem:[%s4019_s11 + $0x18] sm:$0xff]  ;;  %v2724_v43 = vpack.c.bf16 %v1207_v40, %v1205_v39  ;;  %v1209_v46 = vld [vmem:[%s4018_s10 + $0x40] sm:$0xff]  ;;  %s4092_s3 = sld [smem:[#allocation19_spill]] }
  0xea   : > { %v1210_v44 = vld [vmem:[%s4018_s10 + $0x48] sm:$0xff]  ;;  %v1212_v45 = vld [vmem:[%s4018_s10 + $0x58] sm:$0xff]  ;;  %v1386_v48 = vld [vmem:[%s4019_s11] sm:$0xff]  ;;  %v2750_v52 = vpack.c.bf16 %v1389_v42, %v1387_v41  ;;  %s4103_s14 = sld [smem:[#allocation29_spill]] }
  0xeb   : > { %s952_s0 = scalar_lea.vmem %s4089_s16, %s3577_s4  ;;  %v1388_v49 = vld [vmem:[%s4019_s11 + $0x10] sm:$0xff]  ;;  %v2726_v50 = vpack.c.bf16 %v1212_v45, %v1210_v44  ;;  %v1391_v53 = vld [vmem:[%s4019_s11 + $0x28] sm:$0xff]  ;;  %v1393_v54 = vld [vmem:[%s4019_s11 + $0x38] sm:$0xff]  ;;  %v989_v45 = vlaneseq }
  0xec   : > { %s946_s30 = scalar_lea.vmem %s4090_s12, %s3577_s4  ;;  %v1007_v2 = vld [vmem:[%s952_s0] sm:$0xff]  ;;  %v1008_v3 = vld [vmem:[%s952_s0 + $0x8] sm:$0xff]  ;;  %v1211_v51 = vld [vmem:[%s4018_s10 + $0x50] sm:$0xff]  ;;  %v2752_v62 = vpack.c.bf16 %v1388_v49, %v1386_v48  ;;  %v2754_v63 = vpack.c.bf16 %v1393_v54, %v1391_v53  ;;  %s4099_s0 = sld [smem:[#allocation34_spill]] }
  0xed   : > { %v3587_v4 = vld [vmem:[%s946_s30] sm:$0xff]  ;;  %v3589_v5 = vld [vmem:[%s946_s30 + $0x8] sm:$0xff]  ;;  %2604 = vmatprep.mubr.msk.f32.mxu1 %vm982_vm0, %v1007_v2  ;;  %v1186_v7 = vld [vmem:[%s4091_s25 + $0x18] sm:$0xff]  ;;  %v2728_v55 = vpack.c.bf16 %v1211_v51, %v1209_v46  ;;  %s966_s16 = scalar_lea.vmem %s4093_s17, %s3577_s4  ;;  %v1492_v46 = vshrl.u32 %v989_v45, 7  ;;  %s4100_s12 = sld [smem:[#allocation28_spill]] }
  0xee   : > { %v1184_v6 = vld [vmem:[%s4091_s25 + $0x8] sm:$0xff]  ;;  %v1183_v8 = vld [vmem:[%s4091_s25] sm:$0xff]  ;;  %2609 = vmatprep.mubr.msk.f32.mxu0 %vm982_vm0, %v3587_v4  ;;  %v1185_v10 = vld [vmem:[%s4091_s25 + $0x10] sm:$0xff]  ;;  %2605 = vmatmul.mubr.msk.f32.vlgmr.msra.gmra.mrb[0].mxu1 %vm982_vm0, %v1008_v3  ;;  %s4101_s30 = sld [smem:[#allocation36_spill]] }
  0xef   : > { %v2734_v9 = vpack.c.bf16 %v1186_v7, %v1184_v6  ;;  %v1188_v11 = vld [vmem:[%s4091_s25 + $0x28] sm:$0xff]  ;;  %v1190_v12 = vld [vmem:[%s4091_s25 + $0x38] sm:$0xff]  ;;  %2610 = vmatmul.mubr.msk.f32.vlgmr.msra.gmra.mrb[0].mxu0 %vm982_vm0, %v3589_v5  ;;  %v2736_v13 = vpack.c.bf16 %v1185_v10, %v1183_v8  ;;  %v1187_v15 = vld [vmem:[%s4091_s25 + $0x20] sm:$0xff]  ;;  %1371 = vmatprep.mubr.f32.mxu1 %v3180_v19  ;;  %s3699_s8 = scalar_lea.vmem %s4092_s3, %s3577_s4 }
  0xf0   : > { %v2738_v14 = vpack.c.bf16 %v1190_v12, %v1188_v11  ;;  %v1189_v16 = vld [vmem:[%s4091_s25 + $0x30] sm:$0xff]  ;;  %v1192_v17 = vld [vmem:[%s4091_s25 + $0x48] sm:$0xff]  ;;  %v1194_v18 = vld [vmem:[%s4091_s25 + $0x58] sm:$0xff]  ;;  %1288 = vmatprep.mubr.f32.mxu0 %v3180_v19  ;;  %2721 = vmatpush1.bf16.msra.mxu0 %v2720_v31 }
  0xf1   : > { %2735 = vmatprep.subr.bf16.mxu1 %v2734_v9  ;;  %v2740_v20 = vpack.c.bf16 %v1189_v16, %v1187_v15  ;;  %v1191_v21 = vld [vmem:[%s4091_s25 + $0x40] sm:$0xff]  ;;  %v1193_v22 = vld [vmem:[%s4091_s25 + $0x50] sm:$0xff]  ;;  %v2742_v23 = vpack.c.bf16 %v1194_v18, %v1192_v17  ;;  %v1196_v24 = vld [vmem:[%s4091_s25 + $0x68] sm:$0xff]  ;;  %2723 = vmatprep.subr.bf16.mxu0 %v2722_v38 }
  0xf2   : > { %2737 = vmatpush1.bf16.msra.mxu1 %v2736_v13  ;;  %v1198_v27 = vld [vmem:[%s4091_s25 + $0x78] sm:$0xff]  ;;  %v2744_v32 = vpack.c.bf16 %v1193_v22, %v1191_v21  ;;  %v1195_v33 = vld [vmem:[%s4091_s25 + $0x60] sm:$0xff]  ;;  %v1197_v37 = vld [vmem:[%s4091_s25 + $0x70] sm:$0xff] }
  0xf3   : > { %2739 = vmatprep.subr.bf16.mxu1 %v2738_v14  ;;  %v2746_v36 = vpack.c.bf16 %v1198_v27, %v1196_v24  ;;  %v2748_v47 = vpack.c.bf16 %v1197_v37, %v1195_v33  ;;  %v1214_v56 = vld [vmem:[%s4018_s10 + $0x68] sm:$0xff]  ;;  %v1216_v57 = vld [vmem:[%s4018_s10 + $0x78] sm:$0xff]  ;;  %v1213_v58 = vld [vmem:[%s4018_s10 + $0x60] sm:$0xff] }
  0xf4   : > { %2725 = vmatpush1.bf16.msra.mxu0 %v2724_v43  ;;  %v1215_v59 = vld [vmem:[%s4018_s10 + $0x70] sm:$0xff]  ;;  %v2730_v60 = vpack.c.bf16 %v1216_v57, %v1214_v56  ;;  %v1181_v61 = vld [vmem:[%s3699_s8] sm:$0xff]  ;;  %v1395_v3 = vld [vmem:[%s4019_s11 + $0x48] sm:$0xff] }
  0xf5   : > { %2727 = vmatprep.subr.bf16.mxu0 %v2726_v50  ;;  %v1390_v0 = vld [vmem:[%s4019_s11 + $0x20] sm:$0xff]  ;;  %v1392_v1 = vld [vmem:[%s4019_s11 + $0x30] sm:$0xff]  ;;  %v2732_v2 = vpack.c.bf16 %v1215_v59, %v1213_v58  ;;  %v1397_v6 = vld [vmem:[%s4019_s11 + $0x58] sm:$0xff]  ;;  %v1497_v50 = vsub.s32 1, %v1492_v46 }
  0xf6   : > { %2741 = vmatpush1.bf16.msra.mxu1 %v2740_v20  ;;  %v3736_v7 = vld [vmem:[%s966_s16] sm:$0xff]  ;;  %v2756_v9 = vpack.c.bf16 %v1392_v1, %v1390_v0  ;;  %v1182_v10 = vld [vmem:[%s3699_s8 + $0x8] sm:$0xff]  ;;  %v2758_v12 = vpack.c.bf16 %v1397_v6, %v1395_v3  ;;  %v1396_v14 = vld [vmem:[%s4019_s11 + $0x50] sm:$0xff]  ;;  %v1493_v3 = vsub.s32 0, %v1492_v46 }
  0xf7   : > { %2743 = vmatprep.subr.bf16.mxu1 %v2742_v23  ;;  %v983_v8 = vsel %vm982_vm0, %v3736_v7, inf  ;;  %v3743_v11 = vld [vmem:[%s966_s16 + $0x8] sm:$0xff]  ;;  %v1394_v13 = vld [vmem:[%s4019_s11 + $0x40] sm:$0xff]  ;;  %v1401_v17 = vld [vmem:[%s4019_s11 + $0x78] sm:$0xff]  ;;  %s4105_s16 = sld [smem:[#allocation33_spill]] }
  0xf8   : > { %2729 = vmatpush1.bf16.msra.mxu0 %v2728_v55  ;;  %v1199_v15 = vld [vmem:[%s820_s5] sm:$0xff]  ;;  %v1399_v16 = vld [vmem:[%s4019_s11 + $0x68] sm:$0xff]  ;;  %984 = vmin.xlane.f32.xlu0 %v983_v8  ;;  %v986_v18 = vsel %vm982_vm0, %v3743_v11, inf  ;;  %v2760_v20 = vpack.c.bf16 %v1396_v14, %v1394_v13  ;;  %v1514_v37 = vld [vmem:[%s4027_s19 + $0x38] sm:$0xff] }
  0xf9   : > { %2731 = vmatprep.subr.bf16.mxu0 %v2730_v60  ;;  %v2762_v21 = vpack.c.bf16 %v1401_v17, %v1399_v16  ;;  %v1398_v22 = vld [vmem:[%s4019_s11 + $0x60] sm:$0xff]  ;;  %v1400_v23 = vld [vmem:[%s4019_s11 + $0x70] sm:$0xff]  ;;  %v1200_v24 = vld [vmem:[%s820_s5 + $0x8] sm:$0xff]  ;;  %s4094_s5 = sld [smem:[#allocation25_spill]] }
  0xfa   : > { %2745 = vmatpush1.bf16.msra.mxu1 %v2744_v32  ;;  %v2764_v25 = vpack.c.bf16 %v1400_v23, %v1398_v22  ;;  %v1384_v26 = vld [vmem:[%s829_s26] sm:$0xff]  ;;  %v1385_v27 = vld [vmem:[%s829_s26 + $0x8] sm:$0xff]  ;;  %s4104_s26 = sld [smem:[#allocation31_spill]] }
  0xfb   : > { %2747 = vmatprep.subr.bf16.mxu1 %v2746_v36  ;;  %v1507_v28 = vld [vmem:[%s4027_s19] sm:$0xff]  ;;  %v1508_v29 = vld [vmem:[%s4027_s19 + $0x8] sm:$0xff]  ;;  %v1509_v30 = vld [vmem:[%s4027_s19 + $0x10] sm:$0xff] }
  0xfc   : > { %2733 = vmatpush1.bf16.msra.mxu0 %v2732_v2  ;;  %987 = vmin.xlane.f32.xlu0 %v986_v18  ;;  %v2766_v31 = vpack.c.bf16 %v1508_v29, %v1507_v28  ;;  %v1511_v33 = vld [vmem:[%s4027_s19 + $0x20] sm:$0xff]  ;;  %v1512_v34 = vld [vmem:[%s4027_s19 + $0x28] sm:$0xff]  ;;  %v1513_v36 = vld [vmem:[%s4027_s19 + $0x30] sm:$0xff] }
  0xfd   : > { %v2774_v35 = vpack.c.bf16 %v1512_v34, %v1511_v33  ;;  %v2778_v38 = vpack.c.bf16 %v1514_v37, %v1513_v36  ;;  %v1515_v39 = vld [vmem:[%s4027_s19 + $0x40] sm:$0xff]  ;;  %v1516_v40 = vld [vmem:[%s4027_s19 + $0x48] sm:$0xff]  ;;  %v1517_v42 = vld [vmem:[%s4027_s19 + $0x50] sm:$0xff] }
  0xfe   : > { %2749 = vmatpush1.bf16.msra.mxu1 %v2748_v47  ;;  %2767 = vmatprep.subr.bf16.mxu0 %v2766_v31  ;;  %v2782_v41 = vpack.c.bf16 %v1516_v40, %v1515_v39  ;;  %v1518_v43 = vld [vmem:[%s4027_s19 + $0x58] sm:$0xff]  ;;  %v1489_v47 = vld [vmem:[#allocation9] sm:$0x3]  ;;  %v1519_v48 = vld [vmem:[%s4027_s19 + $0x60] sm:$0xff] }
  0xff   : > { %2751 = vmatprep.subr.bf16.mxu1 %v2750_v52  ;;  %2514 = vmatmul.mubr.msk.f32.vlgmr.msra.gmra.mrb[2].mxu0 %vm1217_vm1, %v1199_v15  ;;  %v2786_v44 = vpack.c.bf16 %v1518_v43, %v1517_v42  ;;  %v1520_v49 = vld [vmem:[%s4027_s19 + $0x68] sm:$0xff]  ;;  %v1498_v52 = vrot.slane %v1489_v47, %v1497_v50  ;;  %v1521_v53 = vld [vmem:[%s4027_s19 + $0x70] sm:$0xff]  ;;  %v1522_v54 = vld [vmem:[%s4027_s19 + $0x78] sm:$0xff]  ;;  %v1494_v8 = vrot.slane %v1489_v47, %v1493_v3 }
 0x100   : > { %1294 = vmatprep.mubr.f32.mxu0 %v3180_v19  ;;  %2769 = vmatpush3.bf16.msra.mxu0 %v2766_v31  ;;  %v2790_v51 = vpack.c.bf16 %v1520_v49, %v1519_v48  ;;  %v2794_v55 = vpack.c.bf16 %v1522_v54, %v1521_v53  ;;  %v1598_v56 = vld [vmem:[%s4028_s20] sm:$0xff]  ;;  %v1734_v47 = vld [vmem:[%s4029_s21 + $0x8] sm:$0xff] }
 0x101   : > { %2516 = vmatmul.mubr.msk.f32.vlgmr.msra.gmra.mrb[2].mxu1 %vm1217_vm1, %v1181_v61  ;;  %v1733_v46 = vld [vmem:[%s4029_s21] sm:$0xff] }
 0x102   : > { %2753 = vmatpush1.bf16.msra.mxu1 %v2752_v62  ;;  %1377 = vmatprep.mubr.f32.mxu1 %v3180_v19  ;;  %v2798_v48 = vpack.c.bf16 %v1734_v47, %v1733_v46 }
 0x103   : > { %2755 = vmatprep.subr.bf16.mxu1 %v2754_v63  ;;  %2515 = vmatmul.mubr.msk.f32.gmra.mrb[4].mxu0 %vm1217_vm1, %v1200_v24 }
 0x105   : > { %2517 = vmatmul.mubr.msk.f32.gmra.mrb[4].mxu1 %vm1217_vm1, %v1182_v10  ;;  %v2513_v10 = vld [vmem:[%s4094_s5] ss:$0 sm:$0xff]  ;;  %s978_s5 = scalar_lea.vmem %s4101_s30, %s3577_s4  ;;  %s4106_s30 = sld [smem:[#allocation35_spill]] }
 0x106   : > { %2757 = vmatpush1.bf16.msra.mxu1 %v2756_v9  ;;  %1472 = vmatprep.mubr.f32.mxu1 %v3180_v19  ;;  %v990_v9 = vand.u32 127, %v989_v45 }
 0x107   : > { %2759 = vmatprep.subr.bf16.mxu1 %v2758_v12 }
 0x108   : > { %vm991_vm2 = vcmp.eq.s32.totalorder %v990_v9, 0 }
 0x10a   : > { %2761 = vmatpush1.bf16.msra.mxu1 %v2760_v20 }
 0x10b   : > { %2763 = vmatprep.subr.bf16.mxu1 %v2762_v21 }
 0x10e   : > { %2765 = vmatpush1.bf16.msra.mxu1 %v2764_v25 }
 0x111   : > { %2518 = vmatmul.mubr.msk.f32.vlgmr.msra.gmra.mrb[2].mxu1 %vm1217_vm1, %v1384_v26 }
 0x112   : > { %1478 = vmatprep.mubr.f32.mxu1 %v3180_v19  ;;  %v1510_v19 = vld [vmem:[%s4027_s19 + $0x18] sm:$0xff] }
 0x113   : > { %v2770_v32 = vpack.c.bf16 %v1510_v19, %v1509_v30 }
 0x115   : > { %2519 = vmatmul.mubr.msk.f32.gmra.mrb[4].mxu1 %vm1217_vm1, %v1385_v27  ;;  %2771 = vmatprep.subr.bf16.mxu0 %v2770_v32 }
 0x116   : > { %2773 = vmatpush3.bf16.msra.mxu0 %v2770_v32  ;;  %v1688_v32 = vand.u32 1, %v990_v9  ;;  %v1906_v9 = vld [vmem:[%s4099_s0 + $0x8] sm:$0xff] }
 0x117   : > { %2775 = vmatprep.subr.bf16.mxu0 %v2774_v35 }
 0x118   : > { %vm3855_vm7 = vcmp.eq.s32.totalorder %v1688_v32, 0  ;;  %vm3861_vm11 = vcmp.eq.s32.totalorder %v1688_v32, 1 }
 0x11a   : > { %2777 = vmatpush3.bf16.msra.mxu0 %v2774_v35 }
 0x11b   : > { %2779 = vmatprep.subr.bf16.mxu0 %v2778_v38 }
 0x11e   : > { %2781 = vmatpush3.bf16.msra.mxu0 %v2778_v38  ;;  %v1997_v38 = vld [vmem:[%s4100_s12 + $0x68] sm:$0xff] }
 0x11f   : > { %2783 = vmatprep.subr.bf16.mxu0 %v2782_v41 }
 0x122   : > { %2785 = vmatpush3.bf16.msra.mxu0 %v2782_v41 }
 0x123   : > { %2787 = vmatprep.subr.bf16.mxu0 %v2786_v44 }
 0x126   : > { %2789 = vmatpush3.bf16.msra.mxu0 %v2786_v44 }
 0x127   : > { %2791 = vmatprep.subr.bf16.mxu0 %v2790_v51 }
 0x12a   : > { %2793 = vmatpush3.bf16.msra.mxu0 %v2790_v51 }
 0x12b   : > { %2795 = vmatprep.subr.bf16.mxu0 %v2794_v55 }
 0x12e   : > { %2797 = vmatpush3.bf16.msra.mxu0 %v2794_v55 }
 0x12f   : > { %2647 = vmatprep.subr.mxu0 %v1598_v56 }
 0x185   : > { %v3832_v6 = vpop.xlane.xlu0 %984 }
 0x186   : > { %vm992_vm3 = vcmp.gt.f32.partialorder %v3832_v6, 0.5 }
 0x187   : > { %vm1000_vm4 = vmand %vm992_vm3, %vm991_vm2 }
 0x188   : > { %v1002_v30 = vsel %vm1000_vm4, 0.0, %v3736_v7 }
 0x189   : > { %v3838_v18 = vpop.xlane.xlu0 %987 }
 0x18a   : > { %vm993_vm5 = vcmp.gt.f32.partialorder %v3838_v18, 0.5  ;;  %v2532_v18 = vld [vmem:[%s4105_s16] ss:$0 sm:$0xff] }
 0x18b   : > { %vm1001_vm6 = vmand %vm993_vm5, %vm991_vm2 }
 0x18c   : > { %v1003_v31 = vsel %vm1001_vm6, 0.0, %v3743_v11 }
 0x1c1   : > { %v2606_v57 = vpop.f32.mrb[0].mxu1 }
 0x1c2   : > { %v2611_v58 = vpop.f32.mrb[0].mxu0  ;;  %v1082_v60 = vpop.f32.mrb[1].mxu1 }
 0x1c3   : > { %v1169_v59 = vadd.f32 %v2611_v58, %v2606_v57  ;;  %v1163_v61 = vpop.f32.mrb[1].mxu0 }
 0x1c4   : > { %v1164_v62 = vadd.f32 %v1163_v61, %v1082_v60 }
 0x1c5   : > { %v1180_v26 = vadd.f32 %v2513_v10, %v1169_v59 }
 0x1c6   : > { %v1179_v16 = vadd.f32 %v2513_v10, %v1164_v62 }
 0x1d2   : > { %v1290_v63 = vpop.f32.mrb[2].mxu0 }
 0x1d3   : > { %v1292_v0 = vpop.f32.mrb[3].mxu0 }
 0x1d6   : > { %v1296_v1 = vpop.f32.mrb[4].mxu0 }
 0x1d7   : > { %v1298_v2 = vpop.f32.mrb[5].mxu0 }
 0x1e4   : > { %v1474_v12 = vpop.f32.mrb[2].mxu1 }
 0x1e5   : > { %v2844_v13 = vadd.f32 %v1474_v12, %v1290_v63  ;;  %v1476_v14 = vpop.f32.mrb[3].mxu1  ;;  %v1984_v12 = vld [vmem:[%s4100_s12] sm:$0xff] }
 0x1e6   : > { %v2845_v15 = vadd.f32 %v1476_v14, %v1292_v0  ;;  %v1986_v14 = vld [vmem:[%s4100_s12 + $0x10] sm:$0xff] }
 0x1e7   : > { %v1501_v17 = vadd.f32 %v2844_v13, %v1494_v8  ;;  %v1985_v13 = vld [vmem:[%s4100_s12 + $0x8] sm:$0xff] }
 0x1e8   : > { %v1480_v20 = vpop.f32.mrb[4].mxu1  ;;  %v3840_v21 = vadd.f32 %v2845_v15, %v1498_v52  ;;  %v2810_v15 = vpack.c.bf16 %v1985_v13, %v1984_v12 }
 0x1e9   : > { %v2846_v22 = vadd.f32 %v1480_v20, %v1296_v1  ;;  %v1482_v23 = vpop.f32.mrb[5].mxu1  ;;  %v1505_v24 = vmul.f32 %v1501_v17, %v1179_v16  ;;  %v1820_v1 = vld [vmem:[%s4030_s22] sm:$0xff]  ;;  %v1987_v16 = vld [vmem:[%s4100_s12 + $0x18] sm:$0xff] }
 0x1ea   : > { %v2847_v25 = vadd.f32 %v1482_v23, %v1298_v2  ;;  %v1821_v2 = vld [vmem:[%s4030_s22 + $0x8] sm:$0xff]  ;;  %v2814_v17 = vpack.c.bf16 %v1987_v16, %v1986_v14  ;;  %v1988_v20 = vld [vmem:[%s4100_s12 + $0x20] sm:$0xff]  ;;  %2811 = vmatprep.subr.bf16.mxu1 %v2810_v15 }
 0x1eb   : > { %v1503_v27 = vadd.f32 %v2846_v22, %v1494_v8  ;;  %2644 = vmatprep.mubr.f32.mxu0 %v1505_v24  ;;  %v2802_v3 = vpack.c.bf16 %v1821_v2, %v1820_v1  ;;  %v1905_v8 = vld [vmem:[%s4099_s0] sm:$0xff]  ;;  %v1989_v22 = vld [vmem:[%s4100_s12 + $0x28] sm:$0xff]  ;;  %2813 = vmatpush3.bf16.msra.mxu1 %v2810_v15  ;;  %v1990_v24 = vld [vmem:[%s4100_s12 + $0x30] sm:$0xff] }
 0x1ec   : > { %v3846_v28 = vadd.f32 %v2847_v25, %v1498_v52  ;;  %v2806_v10 = vpack.c.bf16 %v1906_v9, %v1905_v8  ;;  %2815 = vmatprep.subr.bf16.mxu1 %v2814_v17  ;;  %v2818_v23 = vpack.c.bf16 %v1989_v22, %v1988_v20  ;;  %v1991_v25 = vld [vmem:[%s4100_s12 + $0x38] sm:$0xff] }
 0x1ed   : > { %v1506_v29 = vmul.f32 %v1503_v27, %v1180_v26  ;;  %v2822_v26 = vpack.c.bf16 %v1991_v25, %v1990_v24  ;;  %v1992_v27 = vld [vmem:[%s4100_s12 + $0x40] sm:$0xff] }
 0x1ef   : > { %2645 = vmatmul.mubr.f32.vlgmr.msra.gmra.mrb[6].mxu0 %v1506_v29  ;;  %2817 = vmatpush3.bf16.msra.mxu1 %v2814_v17  ;;  %v1993_v29 = vld [vmem:[%s4100_s12 + $0x48] sm:$0xff] }
 0x1f0   : > { %2648 = vmatpush3.msra.mxu0 %v1598_v56  ;;  %2649 = vmatprep.mubr.msk.f32.mxu0 %vm982_vm0, %v1002_v30  ;;  %v2826_v30 = vpack.c.bf16 %v1993_v29, %v1992_v27 }
 0x1f1   : > { %2799 = vmatprep.subr.bf16.mxu0 %v2798_v48  ;;  %2819 = vmatprep.subr.bf16.mxu1 %v2818_v23 }
 0x1f3   : > { %2650 = vmatmul.mubr.msk.f32.vlgmr.msra.gmra.mrb[8].mxu0 %vm982_vm0, %v1003_v31  ;;  %2821 = vmatpush3.bf16.msra.mxu1 %v2818_v23  ;;  %v1994_v31 = vld [vmem:[%s4100_s12 + $0x50] sm:$0xff] }
 0x1f4   : > { %2801 = vmatpush3.bf16.msra.mxu0 %v2798_v48  ;;  %2823 = vmatprep.subr.bf16.mxu1 %v2822_v26 }
 0x1f5   : > { %2803 = vmatprep.subr.bf16.mxu0 %v2802_v3 }
 0x1f7   : > { %2825 = vmatpush3.bf16.msra.mxu1 %v2822_v26 }
 0x1f8   : > { %2827 = vmatprep.subr.bf16.mxu1 %v2826_v30 }
 0x1fb   : > { %2829 = vmatpush3.bf16.msra.mxu1 %v2826_v30 }
 0x2c2   : > { %v2646_v19 = vpop.f32.mrb[6].mxu0 }
 0x2c3   : > { %v1589_v33 = vpop.f32.mrb[7].mxu0 }
 0x2c6   : > { %v2651_v34 = vpop.f32.mrb[8].mxu0 }
 0x2c7   : > { %vm1681_vm8 = vcmp.gt.f32.partialorder %v2651_v34, 0.5  ;;  %v1671_v36 = vpop.f32.mrb[9].mxu0 }
 0x2c8   : > { %v1683_v7 = vsel %vm1681_vm8, -1e+30, %v2646_v19  ;;  %vm1680_vm10 = vcmp.gt.f32.partialorder %v1671_v36, 0.5  ;;  %v1995_v19 = vld [vmem:[%s4100_s12 + $0x58] sm:$0xff] }
 0x2c9   : > { %v1682_v37 = vsel %vm1680_vm10, -1e+30, %v1589_v33  ;;  %v1700_v11 = vsel %vm3855_vm7, %v1683_v7, -1e+30  ;;  %v1716_v44 = vsel %vm3861_vm11, %v1683_v7, -1e+30  ;;  %v2830_v32 = vpack.c.bf16 %v1995_v19, %v1994_v31 }
 0x2ca   : > { %v1705_v39 = vsel %vm1701_vm9, %v1700_v11, -inf  ;;  %v1699_v40 = vsel %vm3855_vm7, %v1682_v37, -1e+30  ;;  %v1715_v42 = vsel %vm3861_vm11, %v1682_v37, -1e+30  ;;  %v1720_v45 = vsel %vm1701_vm9, %v1716_v44, -inf }
 0x2cb   : > { %1706 = vmax.xlane.f32.xlu0 %v1705_v39  ;;  %v1702_v41 = vsel %vm1701_vm9, %v1699_v40, -inf  ;;  %v1717_v43 = vsel %vm1701_vm9, %v1715_v42, -inf  ;;  %2831 = vmatprep.subr.bf16.mxu1 %v2830_v32  ;;  %v1996_v11 = vld [vmem:[%s4100_s12 + $0x60] sm:$0xff]  ;;  %v1998_v40 = vld [vmem:[%s4100_s12 + $0x70] sm:$0xff] }
 0x2cc   : > { %1703 = vmax.xlane.f32.xlu1 %v1702_v41  ;;  %2833 = vmatpush3.bf16.msra.mxu1 %v2830_v32  ;;  %v2834_v39 = vpack.c.bf16 %v1997_v38, %v1996_v11  ;;  %v1999_v41 = vld [vmem:[%s4100_s12 + $0x78] sm:$0xff] }
 0x2cd   : > { %v2838_v42 = vpack.c.bf16 %v1999_v41, %v1998_v40 }
 0x2ce   : > { %2835 = vmatprep.subr.bf16.mxu1 %v2834_v39 }
 0x2d0   : > { %1718 = vmax.xlane.f32.xlu1 %v1717_v43  ;;  %2837 = vmatpush3.bf16.msra.mxu1 %v2834_v39  ;;  %v2084_v43 = vld [vmem:[#allocation10] sm:$0xff] }
 0x2d1   : > { %2839 = vmatprep.subr.bf16.mxu1 %v2838_v42 }
 0x2d4   : > { %1721 = vmax.xlane.f32.xlu1 %v1720_v45  ;;  %2841 = vmatpush3.bf16.msra.mxu1 %v2838_v42 }
 0x2d5   : > { %2708 = vmatprep.subr.mxu1 %v2084_v43 }
 0x358   : > { %v1707_v53 = vpop.xlane.xlu0 %1706 }
 0x359   : > { %v1704_v49 = vpop.xlane.xlu1 %1703  ;;  %v1709_v57 = vsel %vm3855_vm7, %v1707_v53, 0.0 }
 0x35a   : > { %v1708_v51 = vsel %vm3855_vm7, %v1704_v49, 0.0 }
 0x35d   : > { %v1719_v50 = vpop.xlane.xlu1 %1718 }
 0x35e   : > { %v1723_v52 = vsel %vm3861_vm11, %v1719_v50, 0.0 }
 0x35f   : > { %v1725_v54 = vadd.f32 %v1723_v52, %v1708_v51  ;;  %v2173_v52 = vld [vmem:[%s4102_s15] sm:$0xff] }
 0x361   : > { %v1727_v55 = vsub.f32 %v1682_v37, %v1725_v54  ;;  %v1722_v56 = vpop.xlane.xlu1 %1721 }
 0x362   : > { %v1724_v58 = vsel %vm3861_vm11, %v1722_v56, 0.0 }
 0x363   : > { %v1729_v59 = vmul.f32 1.442695, %v1727_v55  ;;  %v1726_v60 = vadd.f32 %v1724_v58, %v1709_v57 }
 0x365   : > { %2940 = vpow2.f32 %v1729_v59  ;;  %v1728_v61 = vsub.f32 %v1683_v7, %v1726_v60 }
 0x367   : > { %v1731_v62 = vmul.f32 1.442695, %v1728_v61 }
 0x369   : > { %2942 = vpow2.f32 %v1731_v62 }
 0x36f   : > { %v2941_v63 = vpop.eup %2940 }
 0x370   : > { %2656 = vmatprep.mubr.msk.f32.mxu0 %vm1701_vm9, %v2941_v63 }
 0x373   : > { %v2943_v0 = vpop.eup %2942 }
 0x374   : > { %2657 = vmatmul.mubr.msk.f32.vlgmr.msra.gmra.mrb[10].mxu0 %vm1701_vm9, %v2943_v0 }
 0x375   : > { %2805 = vmatpush3.bf16.msra.mxu0 %v2802_v3 }
 0x376   : > { %2807 = vmatprep.subr.bf16.mxu0 %v2806_v10 }
 0x447   : > { %v2658_v33 = vpop.f32.mrb[10].mxu0 }
 0x448   : > { %2944 = vrcp.f32 %v2658_v33  ;;  %v1807_v34 = vpop.f32.mrb[11].mxu0 }
 0x449   : > { %2946 = vrcp.f32 %v1807_v34 }
 0x452   : > { %v2945_v35 = vpop.eup %2944 }
 0x453   : > { %v2947_v36 = vpop.eup %2946  ;;  %v1819_v37 = vmul.f32 %v2945_v35, %v2943_v0 }
 0x454   : > { %v1817_v7 = vmul.f32 %v2947_v36, %v2941_v63 }
 0x456   : > { %2663 = vmatprep.mubr.msk.f32.mxu0 %vm1701_vm9, %v1817_v7 }
 0x457   : > { %2664 = vmatmul.mubr.msk.f32.vlgmr.msra.gmra.mrb[12].mxu0 %vm1701_vm9, %v1819_v37 }
 0x458   : > { %2809 = vmatpush3.bf16.msra.mxu0 %v2806_v10  ;;  %2670 = vmatprep.mubr.msk.f32.mxu0 %vm1701_vm9, %v1817_v7 }
 0x459   : > { %2713 = vmatprep.subr.mxu0 %v2173_v52 }
 0x45b   : > { %2671 = vmatmul.mubr.msk.f32.vlgmr.msra.gmra.mrb[14].mxu0 %vm1701_vm9, %v1819_v37 }
 0x45c   : > { %2714 = vmatpush3.msra.mxu0 %v2173_v52 }
 0x52a   : > { %v2665_v44 = vpop.f32.mrb[12].mxu0 }
 0x52b   : > { %v1894_v45 = vpop.f32.mrb[13].mxu0  ;;  %v1904_v47 = vsel %vm993_vm5, 0.0, %v2665_v44 }
 0x52c   : > { %v1903_v46 = vsel %vm992_vm3, 0.0, %v1894_v45  ;;  %2265 = vst.msk [vmem:[%s978_s5 + $0x8] sm:$0xff] %vm982_vm0, %v1904_v47 }
 0x52d   : > { %2264 = vst.msk [vmem:[%s978_s5] sm:$0xff] %vm982_vm0, %v1903_v46  ;;  %s972_s5 = scalar_lea.vmem %s4106_s30, %s3577_s4 }
 0x52e   : > { %v2672_v48 = vpop.f32.mrb[14].mxu0 }
 0x52f   : > { %v1983_v49 = vmul.f32 %v2672_v48, %v3846_v28  ;;  %v1973_v50 = vpop.f32.mrb[15].mxu0  ;;  %v2528_v28 = vld [vmem:[%s4103_s14] ss:$0 sm:$0xff] }
 0x530   : > { %v1982_v51 = vmul.f32 %v1973_v50, %v3840_v21 }
 0x532   : > { %2705 = vmatprep.mubr.f32.mxu1 %v1982_v51 }
 0x533   : > { %2706 = vmatmul.mubr.f32.vlgmr.msra.gmra.mrb[6].mxu1 %v1983_v49 }
 0x534   : > { %2709 = vmatpush3.msra.mxu1 %v2084_v43  ;;  %2710 = vmatprep.mubr.msk.f32.mxu1 %vm982_vm0, %v3587_v4 }
 0x537   : > { %2711 = vmatmul.mubr.msk.f32.vlgmr.msra.gmra.mrb[8].mxu1 %vm982_vm0, %v3589_v5  ;;  %v2531_v5 = vld [vmem:[%s4104_s26] ss:$0 sm:$0xff] }
 0x606   : > { %v2707_v21 = vpop.f32.mrb[6].mxu1 }
 0x607   : > { %v2079_v53 = vadd.f32 %v2707_v21, %v2528_v28  ;;  %v2073_v54 = vpop.f32.mrb[7].mxu1 }
 0x608   : > { %v2074_v55 = vadd.f32 %v2528_v28, %v2073_v54 }
 0x609   : > { %v2083_v4 = vsel %vm993_vm5, 0.0, %v2079_v53 }
 0x60a   : > { %v2712_v56 = vpop.f32.mrb[8].mxu1  ;;  %v2082_v57 = vsel %vm992_vm3, 0.0, %v2074_v55 }
 0x60b   : > { %v2161_v58 = vadd.f32 %v2712_v56, %v2083_v4  ;;  %v2151_v59 = vpop.f32.mrb[9].mxu1 }
 0x60c   : > { %v2160_v60 = vadd.f32 %v2151_v59, %v2082_v57 }
 0x60d   : > { %v2170_v61 = vadd.f32 %v2531_v5, %v2161_v58 }
 0x60e   : > { %v2169_v62 = vadd.f32 %v2531_v5, %v2160_v60 }
 0x60f   : > { %v2172_v0 = vmax.f32 %v2170_v61, 0.0 }
 0x610   : > { %v2171_v63 = vmax.f32 %v2169_v62, 0.0 }
 0x612   : > { %2715 = vmatprep.mubr.msk.f32.mxu0 %vm982_vm0, %v2171_v63 }
 0x613   : > { %2716 = vmatmul.mubr.msk.f32.vlgmr.msra.gmra.mrb[16].mxu0 %vm982_vm0, %v2172_v0 }
 0x6e6   : > { %v2717_v1 = vpop.f32.mrb[16].mxu0 }
 0x6e7   : > { %v2253_v6 = vpop.f32.mrb[17].mxu0  ;;  %v2259_v3 = vadd.f32 %v2717_v1, %v2532_v18 }
 0x6e8   : > { %v2254_v2 = vadd.f32 %v2532_v18, %v2253_v6 }
 0x6e9   : > { %2263 = vst.msk [vmem:[%s972_s5 + $0x8] sm:$0xff] %vm982_vm0, %v2259_v3 }
 0x6ea   : > { %2262 = vst.msk [vmem:[%s972_s5] sm:$0xff] %vm982_vm0, %v2254_v2 }
 0x6eb PF: > { %p41_p2 = scmp.ge.s32.totalorder %s3447_s27, 4   ;;  %s4107_s29 = smov %s3162_s2 }
 0x6ec   : > { %s4108_s2 = smov %s3166_s6  ;;  %s4109_s6 = smov %s3458_s23 }
 0x6ed   : > { %s4110_s30 = smov %s3447_s27  ;;  %43 = sbr.rel (!%p41_p2) target bundleno = 28 (0x1c), region = 209 }
 0x6f4   :  { %2305 = vsyncpa [#allocation3], 1 }
 0x6f5   :  { %2307 = vsyncpa [#allocation3 + $0x1], 1 }
 0x6f6   :  { %2308 = vsyncpa [#allocation5], 1 }
 0x6f7   :  { %2310 = vsyncpa [#allocation5 + $0x1], 1 }
 0x6f8   :  { %2311 = vsyncpa [#allocation8], 1 }
 0x6f9   :  { %2312 = vsyncpa [#allocation11], 1 }

</bundles_post_ra>
